<compile_context>
chip_gen: v5e
topology: v5e:2x2
jax: 0.10.0
libtpu: 0.0.40
codegen_flags: <defaults>
</compile_context>

<pallas_src>
import jax
import jax.numpy as jnp
from jax import lax
from jax.experimental import pallas as pl
from jax.experimental.pallas import tpu as pltpu

# ----------------------------- model config --------------------------------
PAD_IDX = 1          # esm1_alphabet.padding_idx
CLS_IDX = 0          # [CLS] / BOS token id
VOCAB = 33           # ESM alphabet size
EMBED_DIM = 128      # synthetic stand-in for esm1.args.embed_dim (real ESM-1b: 1280)
NUM_HEADS = 4
HEAD_DIM = EMBED_DIM // NUM_HEADS
FFN_DIM = 4 * EMBED_DIM
NUM_LAYERS = 2       # synthetic stand-in for the 33 ESM-1b layers (repr_layers=[33] == last)
NUM_LABELS = 1195
NUM_LABELS_PAD = 1280  # padded to a multiple of 128 lanes for dense vst
CLS_HIDDEN = 512
MAX_POS = 64
BATCH_BLOCK = 1      # batch block size for the parallel grid axis


# ------------------------------- kernels ------------------------------------
def _layer_norm(v, w, b, eps=1e-5):
    mu = jnp.mean(v, axis=-1, keepdims=True)
    var = jnp.mean(jnp.square(v - mu), axis=-1, keepdims=True)
    return (v - mu) * lax.rsqrt(var + eps) * w + b


def encoder_stack_kernel(x_ref, maskb_ref,
                         ln1w_ref, ln1b_ref,
                         wqkv_ref, bqkv_ref,
                         wo_ref, bo_ref,
                         ln2w_ref, ln2b_ref,
                         w1_ref, b1_ref, w2_ref, b2_ref,
                         out_ref):
    """All encoder layers. grid = (batch_blocks, layers).  The activation block
    is resident in out_ref across the layer axis; per-layer weights stream."""
    layer = pl.program_id(1)

    @pl.when(layer == 0)
    def _():
        out_ref[...] = x_ref[...]

    Bb, S, D = out_ref.shape
    H, hd = NUM_HEADS, HEAD_DIM
    M = Bb * S

    x2 = out_ref[...].reshape(M, D)                       # f32 residual stream

    # --- multi-head self-attention (fused QKV, bf16 MXU, f32 accumulate) ---
    h = _layer_norm(x2, ln1w_ref[0], ln1b_ref[0])
    qkv = jnp.dot(h.astype(jnp.bfloat16), wqkv_ref[0],
                  preferred_element_type=jnp.float32) + bqkv_ref[0]   # (M, 3D)

    scale = 1.0 / (hd ** 0.5)
    q = qkv[:, 0 * D:1 * D] * scale                       # scale folded into q once
    k = qkv[:, 1 * D:2 * D]
    v = qkv[:, 2 * D:3 * D]
    # (M, D) -> (Bb*H, S, hd): one batched attention instead of a per-head loop
    q = q.reshape(Bb, S, H, hd).transpose(0, 2, 1, 3).reshape(Bb * H, S, hd)
    k = k.reshape(Bb, S, H, hd).transpose(0, 2, 1, 3).reshape(Bb * H, S, hd)
    v = v.reshape(Bb, S, H, hd).transpose(0, 2, 1, 3).reshape(Bb * H, S, hd)

    s = jnp.einsum('nqd,nkd->nqk', q.astype(jnp.bfloat16), k.astype(jnp.bfloat16),
                   preferred_element_type=jnp.float32)    # (Bb*H, S, S)
    s = s.reshape(Bb, H, S, S) + maskb_ref[...][:, None, :, :]   # key-padding bias
    s = s - jnp.max(s, axis=-1, keepdims=True)            # stable softmax (f32)
    p = jnp.exp(s)
    p = p * pl.reciprocal(jnp.sum(p, axis=-1, keepdims=True), approx=True)
    p = p.reshape(Bb * H, S, S)

    ctx = jnp.einsum('nqk,nkd->nqd', p.astype(jnp.bfloat16), v.astype(jnp.bfloat16),
                     preferred_element_type=jnp.float32)  # (Bb*H, S, hd)
    ctx = ctx.reshape(Bb, H, S, hd).transpose(0, 2, 1, 3).reshape(M, D)

    attn_out = jnp.dot(ctx.astype(jnp.bfloat16), wo_ref[0],
                       preferred_element_type=jnp.float32) + bo_ref[0]
    x2 = x2 + attn_out                                    # residual

    # --- feed-forward ---
    h = _layer_norm(x2, ln2w_ref[0], ln2b_ref[0])
    f = jnp.dot(h.astype(jnp.bfloat16), w1_ref[0],
                preferred_element_type=jnp.float32) + b1_ref[0]
    # TODO(synk): ESM uses the exact erf GELU; tanh approximation used here.
    f = jax.nn.gelu(f, approximate=True)
    f = jnp.dot(f.astype(jnp.bfloat16), w2_ref[0],
                preferred_element_type=jnp.float32) + b2_ref[0]
    x2 = x2 + f                                           # residual

    out_ref[...] = x2.reshape(Bb, S, D)


def classify_head_kernel(cls_ref, lnfw_ref, lnfb_ref,
                         w1_ref, b1_ref, w2_ref, b2_ref, out_ref):
    """emb_layer_norm_after (CLS rows only) + Pooler('cls') + classification MLP."""
    h = _layer_norm(cls_ref[...], lnfw_ref[...], lnfb_ref[...])   # (B, D)
    a = jnp.dot(h.astype(jnp.bfloat16), w1_ref[...],
                preferred_element_type=jnp.float32) + b1_ref[...]
    a = jnp.maximum(a, 0.0)                                        # ReLU
    out_ref[...] = jnp.dot(a.astype(jnp.bfloat16), w2_ref[...],
                           preferred_element_type=jnp.float32) + b2_ref[...]


# ------------------------------ wrappers -------------------------------------
def encoder_stack(x, mask_bias, lp, batch_block=BATCH_BLOCK):
    B, S, D = x.shape
    L = lp['wqkv'].shape[0]
    BB = batch_block
    nb = B // BB

    xmap = lambda b, l: (b, 0, 0)   # activation / mask blocks: constant across layers
    wmap = lambda b, l: (l, 0, 0)   # per-layer weight blocks: stream over layer axis

    in_specs = [
        pl.BlockSpec((BB, S, D), xmap),            # x
        pl.BlockSpec((BB, 1, S), xmap),            # mask bias
        pl.BlockSpec((1, 1, D), wmap),             # ln1_w
        pl.BlockSpec((1, 1, D), wmap),             # ln1_b
        pl.BlockSpec((1, D, 3 * D), wmap),         # wqkv (bf16)
        pl.BlockSpec((1, 1, 3 * D), wmap),         # bqkv
        pl.BlockSpec((1, D, D), wmap),             # wo (bf16)
        pl.BlockSpec((1, 1, D), wmap),             # bo
        pl.BlockSpec((1, 1, D), wmap),             # ln2_w
        pl.BlockSpec((1, 1, D), wmap),             # ln2_b
        pl.BlockSpec((1, D, FFN_DIM), wmap),       # w1 (bf16)
        pl.BlockSpec((1, 1, FFN_DIM), wmap),       # b1
        pl.BlockSpec((1, FFN_DIM, D), wmap),       # w2 (bf16)
        pl.BlockSpec((1, 1, D), wmap),             # b2
    ]

    flops = L * (2 * B * S * D * (3 * D + D + 2 * FFN_DIM) + 4 * B * S * S * D)
    trans = L * (B * NUM_HEADS * S * S + B * S * FFN_DIM)
    w_bytes = sum(int(v.size) * v.dtype.itemsize for v in lp.values())
    bytes_accessed = int(w_bytes + 2 * x.size * 4 + mask_bias.size * 4)

    return pl.pallas_call(
        encoder_stack_kernel,
        out_shape=jax.ShapeDtypeStruct((B, S, D), jnp.float32),
        grid=(nb, L),
        in_specs=in_specs,
        out_specs=pl.BlockSpec((BB, S, D), xmap),
        compiler_params=pltpu.CompilerParams(
            dimension_semantics=("parallel", "arbitrary"),
            vmem_limit_bytes=48 * 1024 * 1024),
        cost_estimate=pl.CostEstimate(flops=flops, transcendentals=trans,
                                      bytes_accessed=bytes_accessed),
    )(x, mask_bias,
      lp['ln1_w'], lp['ln1_b'], lp['wqkv'], lp['bqkv'], lp['wo'], lp['bo'],
      lp['ln2_w'], lp['ln2_b'], lp['w1'], lp['b1'], lp['w2'], lp['b2'])


def classify_head(x_cls, hp):
    B = x_cls.shape[0]
    ins = [x_cls, hp['lnf_w'], hp['lnf_b'], hp['w1'], hp['b1'], hp['w2'], hp['b2']]
    logits_pad = pl.pallas_call(
        classify_head_kernel,
        out_shape=jax.ShapeDtypeStruct((B, NUM_LABELS_PAD), jnp.float32),
        in_specs=[pl.BlockSpec(memory_space=pltpu.MemorySpace.VMEM) for _ in ins],
        out_specs=pl.BlockSpec(memory_space=pltpu.MemorySpace.VMEM),
        compiler_params=pltpu.CompilerParams(vmem_limit_bytes=48 * 1024 * 1024),
    )(*ins)
    return logits_pad[:, :NUM_LABELS]   # drop lane padding outside the kernel


def model_forward(input_ids, params, targets=None):
    """ProteinBertForSequenceClassification.forward (inference path)."""
    B, S = input_ids.shape
    # --- embeddings (glue) ---
    x = params['embed_tokens'][input_ids]                        # (B,S,D)
    # TODO(synk): ESM's LearnedPositionalEmbedding offsets positions by padding_idx
    # and skips pads; plain arange positions used here.
    x = x + params['embed_positions'][jnp.arange(S)][None]
    mu = x.mean(-1, keepdims=True)
    var = ((x - mu) ** 2).mean(-1, keepdims=True)
    x = (x - mu) * lax.rsqrt(var + 1e-5)                         # emb_layer_norm_before
    x = (x * params['emb_ln_before_w'] + params['emb_ln_before_b']).astype(jnp.float32)

    # additive key-padding attention bias
    mask_bias = jnp.where(input_ids == PAD_IDX, -1e9, 0.0).astype(jnp.float32)[:, None, :]

    # --- all transformer encoder layers in one fused Pallas call ---
    x = encoder_stack(x, mask_bias, params['layers'])

    # --- Pooler('cls'): only CLS rows feed the head -> LayerNorm only those rows ---
    x_cls = x[:, 0, :]
    logits = classify_head(x_cls, params['head'])
    # TODO(synk): when targets is not None the PyTorch head also returns a
    # cross-entropy loss; only logits are produced here.
    return logits


# --------------------------- parameter init ----------------------------------
def init_params(key):
    def dense(k, shape, dtype=jnp.bfloat16):
        return (0.02 * jax.random.normal(k, shape)).astype(dtype)

    keys = jax.random.split(key, 4)
    params = {
        'embed_tokens': dense(keys[0], (VOCAB, EMBED_DIM), jnp.float32),
        'embed_positions': dense(keys[1], (MAX_POS, EMBED_DIM), jnp.float32),
        'emb_ln_before_w': jnp.ones((EMBED_DIM,), jnp.float32),
        'emb_ln_before_b': jnp.zeros((EMBED_DIM,), jnp.float32),
    }

    L, D, F = NUM_LAYERS, EMBED_DIM, FFN_DIM
    lk = jax.random.split(keys[2], 4)
    params['layers'] = dict(
        ln1_w=jnp.ones((L, 1, D), jnp.float32),
        ln1_b=jnp.zeros((L, 1, D), jnp.float32),
        wqkv=dense(lk[0], (L, D, 3 * D)),                  # fused [wq|wk|wv], bf16
        bqkv=jnp.zeros((L, 1, 3 * D), jnp.float32),
        wo=dense(lk[1], (L, D, D)),
        bo=jnp.zeros((L, 1, D), jnp.float32),
        ln2_w=jnp.ones((L, 1, D), jnp.float32),
        ln2_b=jnp.zeros((L, 1, D), jnp.float32),
        w1=dense(lk[2], (L, D, F)),
        b1=jnp.zeros((L, 1, F), jnp.float32),
        w2=dense(lk[3], (L, F, D)),
        b2=jnp.zeros((L, 1, D), jnp.float32),
    )

    hk = jax.random.split(keys[3], 2)
    w2 = dense(hk[1], (CLS_HIDDEN, NUM_LABELS))
    w2 = jnp.pad(w2, ((0, 0), (0, NUM_LABELS_PAD - NUM_LABELS)))   # lane padding
    params['head'] = dict(
        lnf_w=jnp.ones((1, EMBED_DIM), jnp.float32),
        lnf_b=jnp.zeros((1, EMBED_DIM), jnp.float32),
        w1=dense(hk[0], (EMBED_DIM, CLS_HIDDEN)),
        b1=jnp.zeros((1, CLS_HIDDEN), jnp.float32),
        w2=w2,
        b2=jnp.zeros((1, NUM_LABELS_PAD), jnp.float32),
    )
    return params


# --------------------------------- main ---------------------------------------
if __name__ == "__main__":
    B, S = 2, 8
    key = jax.random.PRNGKey(0)
    k_tok, k_param = jax.random.split(key)

    input_ids = jax.random.randint(k_tok, (B, S), 4, VOCAB).astype(jnp.int32)
    input_ids = input_ids.at[:, 0].set(CLS_IDX)            # [CLS] / BOS
    input_ids = input_ids.at[1, S - 2:].set(PAD_IDX)       # some padding

    params = init_params(k_param)

    logits = model_forward(input_ids, params)
    logits = jax.block_until_ready(logits)

    assert logits.shape == (B, NUM_LABELS), logits.shape
    assert bool(jnp.all(jnp.isfinite(logits)))
    print("KERNEL_OK")
</pallas_src>

<mosaic_0001>
module attributes {stable_mosaic.version = 11 : i64} {
  func.func @encoder_stack_kernel(%arg0: i32, %arg1: i32, %arg2: memref<1x8x128xf32, #tpu.memory_space<vmem>>, %arg3: memref<1x1x8xf32, #tpu.memory_space<vmem>>, %arg4: memref<1x1x128xf32, #tpu.memory_space<vmem>>, %arg5: memref<1x1x128xf32, #tpu.memory_space<vmem>>, %arg6: memref<1x128x384xbf16, #tpu.memory_space<vmem>>, %arg7: memref<1x1x384xf32, #tpu.memory_space<vmem>>, %arg8: memref<1x128x128xbf16, #tpu.memory_space<vmem>>, %arg9: memref<1x1x128xf32, #tpu.memory_space<vmem>>, %arg10: memref<1x1x128xf32, #tpu.memory_space<vmem>>, %arg11: memref<1x1x128xf32, #tpu.memory_space<vmem>>, %arg12: memref<1x128x512xbf16, #tpu.memory_space<vmem>>, %arg13: memref<1x1x512xf32, #tpu.memory_space<vmem>>, %arg14: memref<1x512x128xbf16, #tpu.memory_space<vmem>>, %arg15: memref<1x1x128xf32, #tpu.memory_space<vmem>>, %arg16: memref<1x8x128xf32, #tpu.memory_space<vmem>>) attributes {dimension_semantics = [#tpu.dimension_semantics<parallel>, #tpu.dimension_semantics<arbitrary>], iteration_bounds = array<i64: 2, 2>, scalar_prefetch = 0 : i64, scratch_operands = 0 : i64, tpu.core_type = #tpu.core_type<tc>, window_params = [{transform_indices = @transform_0, window_bounds = array<i64: 1, 8, 128>}, {transform_indices = @transform_1, window_bounds = array<i64: 1, 1, 8>}, {transform_indices = @transform_2, window_bounds = array<i64: 1, 1, 128>}, {transform_indices = @transform_3, window_bounds = array<i64: 1, 1, 128>}, {transform_indices = @transform_4, window_bounds = array<i64: 1, 128, 384>}, {transform_indices = @transform_5, window_bounds = array<i64: 1, 1, 384>}, {transform_indices = @transform_6, window_bounds = array<i64: 1, 128, 128>}, {transform_indices = @transform_7, window_bounds = array<i64: 1, 1, 128>}, {transform_indices = @transform_8, window_bounds = array<i64: 1, 1, 128>}, {transform_indices = @transform_9, window_bounds = array<i64: 1, 1, 128>}, {transform_indices = @transform_10, window_bounds = array<i64: 1, 128, 512>}, {transform_indices = @transform_11, window_bounds = array<i64: 1, 1, 512>}, {transform_indices = @transform_12, window_bounds = array<i64: 1, 512, 128>}, {transform_indices = @transform_13, window_bounds = array<i64: 1, 1, 128>}, {transform_indices = @transform_14, window_bounds = array<i64: 1, 8, 128>}]} {
    %c0_i32 = arith.constant 0 : i32
    %0 = arith.cmpi eq, %arg1, %c0_i32 : i32
    %1 = arith.extui %0 : i1 to i32
    %c0_i32_0 = arith.constant 0 : i32
    %2 = arith.cmpi ne, %1, %c0_i32_0 : i32
    scf.if %2 {
      %c0_67 = arith.constant 0 : index
      %c0_68 = arith.constant 0 : index
      %c0_69 = arith.constant 0 : index
      %145 = vector.load %arg2[%c0_67, %c0_68, %c0_69] : memref<1x8x128xf32, #tpu.memory_space<vmem>>, vector<1x8x128xf32>
      %c0_70 = arith.constant 0 : index
      %c0_71 = arith.constant 0 : index
      %c0_72 = arith.constant 0 : index
      %146 = vector.load %arg16[%c0_70, %c0_71, %c0_72] : memref<1x8x128xf32, #tpu.memory_space<vmem>>, vector<1x8x128xf32>
      tpu.vector_store %arg16[%c0_70, %c0_71, %c0_72], %145 {strides = array<i32>} : memref<1x8x128xf32, #tpu.memory_space<vmem>>, vector<1x8x128xf32>,
    } else {
    }
    %c0 = arith.constant 0 : index
    %c0_1 = arith.constant 0 : index
    %c0_2 = arith.constant 0 : index
    %3 = vector.load %arg16[%c0, %c0_1, %c0_2] : memref<1x8x128xf32, #tpu.memory_space<vmem>>, vector<1x8x128xf32>
    %4 = vector.shape_cast %3 : vector<1x8x128xf32> to vector<8x128xf32>
    %c0_3 = arith.constant 0 : index
    %c0_4 = arith.constant 0 : index
    %c0_5 = arith.constant 0 : index
    %5 = vector.load %arg4[%c0_3, %c0_4, %c0_5] : memref<1x1x128xf32, #tpu.memory_space<vmem>>, vector<1x1x128xf32>
    %6 = vector.shape_cast %5 : vector<1x1x128xf32> to vector<1x128xf32>
    %c0_6 = arith.constant 0 : index
    %c0_7 = arith.constant 0 : index
    %c0_8 = arith.constant 0 : index
    %7 = vector.load %arg5[%c0_6, %c0_7, %c0_8] : memref<1x1x128xf32, #tpu.memory_space<vmem>>, vector<1x1x128xf32>
    %8 = vector.shape_cast %7 : vector<1x1x128xf32> to vector<1x128xf32>
    %cst = arith.constant dense<0.000000e+00> : vector<8xf32>
    %9 = vector.multi_reduction <add>, %4, %cst [1] : vector<8x128xf32> to vector<8xf32>
    %10 = vector.shape_cast %9 : vector<8xf32> to vector<8x1xf32>
    %cst_9 = arith.constant 1.280000e+02 : f32
    %11 = vector.broadcast %cst_9 : f32 to vector<8x1xf32>
    %12 = arith.divf %10, %11 : vector<8x1xf32>
    %13 = vector.broadcast %12 : vector<8x1xf32> to vector<8x128xf32>
    %14 = arith.subf %4, %13 : vector<8x128xf32>
    %15 = arith.mulf %14, %14 : vector<8x128xf32>
    %cst_10 = arith.constant dense<0.000000e+00> : vector<8xf32>
    %16 = vector.multi_reduction <add>, %15, %cst_10 [1] : vector<8x128xf32> to vector<8xf32>
    %17 = vector.shape_cast %16 : vector<8xf32> to vector<8x1xf32>
    %cst_11 = arith.constant 1.280000e+02 : f32
    %18 = vector.broadcast %cst_11 : f32 to vector<8x1xf32>
    %19 = arith.divf %17, %18 : vector<8x1xf32>
    %20 = vector.broadcast %12 : vector<8x1xf32> to vector<8x128xf32>
    %21 = arith.subf %4, %20 : vector<8x128xf32>
    %cst_12 = arith.constant 9.99999974E-6 : f32
    %22 = vector.broadcast %cst_12 : f32 to vector<8x1xf32>
    %23 = arith.addf %19, %22 : vector<8x1xf32>
    %24 = math.rsqrt %23 : vector<8x1xf32>
    %25 = vector.broadcast %24 : vector<8x1xf32> to vector<8x128xf32>
    %26 = arith.mulf %21, %25 : vector<8x128xf32>
    %27 = vector.broadcast %6 : vector<1x128xf32> to vector<8x128xf32>
    %28 = arith.mulf %26, %27 : vector<8x128xf32>
    %29 = vector.broadcast %8 : vector<1x128xf32> to vector<8x128xf32>
    %30 = arith.addf %28, %29 : vector<8x128xf32>
    %31 = arith.truncf %30 : vector<8x128xf32> to vector<8x128xbf16>
    %c0_13 = arith.constant 0 : index
    %c0_14 = arith.constant 0 : index
    %c0_15 = arith.constant 0 : index
    %32 = vector.load %arg6[%c0_13, %c0_14, %c0_15] : memref<1x128x384xbf16, #tpu.memory_space<vmem>>, vector<1x128x384xbf16>
    %33 = vector.shape_cast %32 : vector<1x128x384xbf16> to vector<128x384xbf16>
    %cst_16 = arith.constant dense<0.000000e+00> : vector<8x384xf32>
    %34 = tpu.matmul %31, %33, %cst_16 {dimension_numbers = #tpu.dot_dimension_numbers<[1], [0], [0], [1], [0, 0, 1, 1], [], []>} : vector<8x128xbf16>, vector<128x384xbf16>, vector<8x384xf32> -> vector<8x384xf32>
    %c0_17 = arith.constant 0 : index
    %c0_18 = arith.constant 0 : index
    %c0_19 = arith.constant 0 : index
    %35 = vector.load %arg7[%c0_17, %c0_18, %c0_19] : memref<1x1x384xf32, #tpu.memory_space<vmem>>, vector<1x1x384xf32>
    %36 = vector.shape_cast %35 : vector<1x1x384xf32> to vector<1x384xf32>
    %37 = vector.broadcast %36 : vector<1x384xf32> to vector<8x384xf32>
    %38 = arith.addf %34, %37 : vector<8x384xf32>
    %39 = vector.extract_strided_slice %38 {offsets = [0, 0], sizes = [8, 128], strides = [1, 1]} : vector<8x384xf32> to vector<8x128xf32>
    %cst_20 = arith.constant 0.176776692 : f32
    %40 = vector.broadcast %cst_20 : f32 to vector<8x128xf32>
    %41 = arith.mulf %39, %40 : vector<8x128xf32>
    %42 = vector.extract_strided_slice %38 {offsets = [0, 128], sizes = [8, 128], strides = [1, 1]} : vector<8x384xf32> to vector<8x128xf32>
    %43 = vector.extract_strided_slice %38 {offsets = [0, 256], sizes = [8, 128], strides = [1, 1]} : vector<8x384xf32> to vector<8x128xf32>
    %44 = vector.shape_cast %41 : vector<8x128xf32> to vector<1x8x4x32xf32>
    %45 = tpu.transpose %44, [0, 2, 1, 3] : vector<1x8x4x32xf32> -> vector<1x4x8x32xf32>
    %46 = vector.shape_cast %45 : vector<1x4x8x32xf32> to vector<4x8x32xf32>
    %47 = vector.shape_cast %42 : vector<8x128xf32> to vector<1x8x4x32xf32>
    %48 = tpu.transpose %47, [0, 2, 1, 3] : vector<1x8x4x32xf32> -> vector<1x4x8x32xf32>
    %49 = vector.shape_cast %48 : vector<1x4x8x32xf32> to vector<4x8x32xf32>
    %50 = vector.shape_cast %43 : vector<8x128xf32> to vector<1x8x4x32xf32>
    %51 = tpu.transpose %50, [0, 2, 1, 3] : vector<1x8x4x32xf32> -> vector<1x4x8x32xf32>
    %52 = vector.shape_cast %51 : vector<1x4x8x32xf32> to vector<4x8x32xf32>
    %53 = arith.truncf %46 : vector<4x8x32xf32> to vector<4x8x32xbf16>
    %54 = arith.truncf %49 : vector<4x8x32xf32> to vector<4x8x32xbf16>
    "tpu.trace_start"() <{level = 10 : i32, message = "nqd,nkd->nqk"}> : () -> ()
    %cst_21 = arith.constant dense<0.000000e+00> : vector<4x8x8xf32>
    %55 = tpu.matmul %53, %54, %cst_21 {dimension_numbers = #tpu.dot_dimension_numbers<[2], [2], [1], [1], [0, 0, 0, 1, 1, 1], [0], [0]>} : vector<4x8x32xbf16>, vector<4x8x32xbf16>, vector<4x8x8xf32> -> vector<4x8x8xf32>
    "tpu.trace_stop"() : () -> ()
    %56 = vector.shape_cast %55 : vector<4x8x8xf32> to vector<1x4x8x8xf32>
    %c0_22 = arith.constant 0 : index
    %c0_23 = arith.constant 0 : index
    %c0_24 = arith.constant 0 : index
    %57 = vector.load %arg3[%c0_22, %c0_23, %c0_24] : memref<1x1x8xf32, #tpu.memory_space<vmem>>, vector<1x1x8xf32>
    %58 = vector.shape_cast %57 : vector<1x1x8xf32> to vector<1x1x1x8xf32>
    %59 = vector.broadcast %58 : vector<1x1x1x8xf32> to vector<1x4x8x8xf32>
    %60 = arith.addf %56, %59 : vector<1x4x8x8xf32>
    %cst_25 = arith.constant dense<0xFF800000> : vector<1x4x8xf32>
    %61 = vector.multi_reduction <maximumf>, %60, %cst_25 [3] : vector<1x4x8x8xf32> to vector<1x4x8xf32>
    %62 = vector.shape_cast %61 : vector<1x4x8xf32> to vector<1x4x8x1xf32>
    %63 = vector.broadcast %62 : vector<1x4x8x1xf32> to vector<1x4x8x8xf32>
    %64 = arith.subf %60, %63 : vector<1x4x8x8xf32>
    %65 = math.exp %64 : vector<1x4x8x8xf32>
    %cst_26 = arith.constant dense<0.000000e+00> : vector<1x4x8xf32>
    %66 = vector.multi_reduction <add>, %65, %cst_26 [3] : vector<1x4x8x8xf32> to vector<1x4x8xf32>
    %67 = vector.shape_cast %66 : vector<1x4x8xf32> to vector<1x4x8x1xf32>
    %68 = tpu.reciprocal %67 {approx = true} : vector<1x4x8x1xf32> -> vector<1x4x8x1xf32>
    %69 = vector.broadcast %68 : vector<1x4x8x1xf32> to vector<1x4x8x8xf32>
    %70 = arith.mulf %65, %69 : vector<1x4x8x8xf32>
    %71 = vector.shape_cast %70 : vector<1x4x8x8xf32> to vector<4x8x8xf32>
    %72 = arith.truncf %71 : vector<4x8x8xf32> to vector<4x8x8xbf16>
    %73 = arith.truncf %52 : vector<4x8x32xf32> to vector<4x8x32xbf16>
    "tpu.trace_start"() <{level = 10 : i32, message = "nqk,nkd->nqd"}> : () -> ()
    %cst_27 = arith.constant dense<0.000000e+00> : vector<4x8x32xf32>
    %74 = tpu.matmul %72, %73, %cst_27 {dimension_numbers = #tpu.dot_dimension_numbers<[2], [1], [1], [2], [0, 0, 0, 1, 1, 2], [0], [0]>} : vector<4x8x8xbf16>, vector<4x8x32xbf16>, vector<4x8x32xf32> -> vector<4x8x32xf32>
    "tpu.trace_stop"() : () -> ()
    %75 = vector.shape_cast %74 : vector<4x8x32xf32> to vector<1x4x8x32xf32>
    %76 = tpu.transpose %75, [0, 2, 1, 3] : vector<1x4x8x32xf32> -> vector<1x8x4x32xf32>
    %77 = vector.shape_cast %76 : vector<1x8x4x32xf32> to vector<8x128xf32>
    %78 = arith.truncf %77 : vector<8x128xf32> to vector<8x128xbf16>
    %c0_28 = arith.constant 0 : index
    %c0_29 = arith.constant 0 : index
    %c0_30 = arith.constant 0 : index
    %79 = vector.load %arg8[%c0_28, %c0_29, %c0_30] : memref<1x128x128xbf16, #tpu.memory_space<vmem>>, vector<1x128x128xbf16>
    %80 = vector.shape_cast %79 : vector<1x128x128xbf16> to vector<128x128xbf16>
    %cst_31 = arith.constant dense<0.000000e+00> : vector<8x128xf32>
    %81 = tpu.matmul %78, %80, %cst_31 {dimension_numbers = #tpu.dot_dimension_numbers<[1], [0], [0], [1], [0, 0, 1, 1], [], []>} : vector<8x128xbf16>, vector<128x128xbf16>, vector<8x128xf32> -> vector<8x128xf32>
    %c0_32 = arith.constant 0 : index
    %c0_33 = arith.constant 0 : index
    %c0_34 = arith.constant 0 : index
    %82 = vector.load %arg9[%c0_32, %c0_33, %c0_34] : memref<1x1x128xf32, #tpu.memory_space<vmem>>, vector<1x1x128xf32>
    %83 = vector.shape_cast %82 : vector<1x1x128xf32> to vector<1x128xf32>
    %84 = vector.broadcast %83 : vector<1x128xf32> to vector<8x128xf32>
    %85 = arith.addf %81, %84 : vector<8x128xf32>
    %86 = arith.addf %4, %85 : vector<8x128xf32>
    %c0_35 = arith.constant 0 : index
    %c0_36 = arith.constant 0 : index
    %c0_37 = arith.constant 0 : index
    %87 = vector.load %arg10[%c0_35, %c0_36, %c0_37] : memref<1x1x128xf32, #tpu.memory_space<vmem>>, vector<1x1x128xf32>
    %88 = vector.shape_cast %87 : vector<1x1x128xf32> to vector<1x128xf32>
    %c0_38 = arith.constant 0 : index
    %c0_39 = arith.constant 0 : index
    %c0_40 = arith.constant 0 : index
    %89 = vector.load %arg11[%c0_38, %c0_39, %c0_40] : memref<1x1x128xf32, #tpu.memory_space<vmem>>, vector<1x1x128xf32>
    %90 = vector.shape_cast %89 : vector<1x1x128xf32> to vector<1x128xf32>
    %cst_41 = arith.constant dense<0.000000e+00> : vector<8xf32>
    %91 = vector.multi_reduction <add>, %86, %cst_41 [1] : vector<8x128xf32> to vector<8xf32>
    %92 = vector.shape_cast %91 : vector<8xf32> to vector<8x1xf32>
    %cst_42 = arith.constant 1.280000e+02 : f32
    %93 = vector.broadcast %cst_42 : f32 to vector<8x1xf32>
    %94 = arith.divf %92, %93 : vector<8x1xf32>
    %95 = vector.broadcast %94 : vector<8x1xf32> to vector<8x128xf32>
    %96 = arith.subf %86, %95 : vector<8x128xf32>
    %97 = arith.mulf %96, %96 : vector<8x128xf32>
    %cst_43 = arith.constant dense<0.000000e+00> : vector<8xf32>
    %98 = vector.multi_reduction <add>, %97, %cst_43 [1] : vector<8x128xf32> to vector<8xf32>
    %99 = vector.shape_cast %98 : vector<8xf32> to vector<8x1xf32>
    %cst_44 = arith.constant 1.280000e+02 : f32
    %100 = vector.broadcast %cst_44 : f32 to vector<8x1xf32>
    %101 = arith.divf %99, %100 : vector<8x1xf32>
    %102 = vector.broadcast %94 : vector<8x1xf32> to vector<8x128xf32>
    %103 = arith.subf %86, %102 : vector<8x128xf32>
    %cst_45 = arith.constant 9.99999974E-6 : f32
    %104 = vector.broadcast %cst_45 : f32 to vector<8x1xf32>
    %105 = arith.addf %101, %104 : vector<8x1xf32>
    %106 = math.rsqrt %105 : vector<8x1xf32>
    %107 = vector.broadcast %106 : vector<8x1xf32> to vector<8x128xf32>
    %108 = arith.mulf %103, %107 : vector<8x128xf32>
    %109 = vector.broadcast %88 : vector<1x128xf32> to vector<8x128xf32>
    %110 = arith.mulf %108, %109 : vector<8x128xf32>
    %111 = vector.broadcast %90 : vector<1x128xf32> to vector<8x128xf32>
    %112 = arith.addf %110, %111 : vector<8x128xf32>
    %113 = arith.truncf %112 : vector<8x128xf32> to vector<8x128xbf16>
    %c0_46 = arith.constant 0 : index
    %c0_47 = arith.constant 0 : index
    %c0_48 = arith.constant 0 : index
    %114 = vector.load %arg12[%c0_46, %c0_47, %c0_48] : memref<1x128x512xbf16, #tpu.memory_space<vmem>>, vector<1x128x512xbf16>
    %115 = vector.shape_cast %114 : vector<1x128x512xbf16> to vector<128x512xbf16>
    %cst_49 = arith.constant dense<0.000000e+00> : vector<8x512xf32>
    %116 = tpu.matmul %113, %115, %cst_49 {dimension_numbers = #tpu.dot_dimension_numbers<[1], [0], [0], [1], [0, 0, 1, 1], [], []>} : vector<8x128xbf16>, vector<128x512xbf16>, vector<8x512xf32> -> vector<8x512xf32>
    %c0_50 = arith.constant 0 : index
    %c0_51 = arith.constant 0 : index
    %c0_52 = arith.constant 0 : index
    %117 = vector.load %arg13[%c0_50, %c0_51, %c0_52] : memref<1x1x512xf32, #tpu.memory_space<vmem>>, vector<1x1x512xf32>
    %118 = vector.shape_cast %117 : vector<1x1x512xf32> to vector<1x512xf32>
    %119 = vector.broadcast %118 : vector<1x512xf32> to vector<8x512xf32>
    %120 = arith.addf %116, %119 : vector<8x512xf32>
    %121 = arith.mulf %120, %120 : vector<8x512xf32>
    %122 = arith.mulf %120, %121 : vector<8x512xf32>
    %cst_53 = arith.constant 4.471500e-02 : f32
    %123 = vector.broadcast %cst_53 : f32 to vector<8x512xf32>
    %124 = arith.mulf %123, %122 : vector<8x512xf32>
    %125 = arith.addf %120, %124 : vector<8x512xf32>
    %cst_54 = arith.constant 0.797884583 : f32
    %126 = vector.broadcast %cst_54 : f32 to vector<8x512xf32>
    %127 = arith.mulf %126, %125 : vector<8x512xf32>
    %128 = math.tanh %127 : vector<8x512xf32>
    %cst_55 = arith.constant 1.000000e+00 : f32
    %129 = vector.broadcast %cst_55 : f32 to vector<8x512xf32>
    %130 = arith.addf %129, %128 : vector<8x512xf32>
    %cst_56 = arith.constant 5.000000e-01 : f32
    %131 = vector.broadcast %cst_56 : f32 to vector<8x512xf32>
    %132 = arith.mulf %131, %130 : vector<8x512xf32>
    %133 = arith.mulf %120, %132 : vector<8x512xf32>
    %134 = arith.truncf %133 : vector<8x512xf32> to vector<8x512xbf16>
    %c0_57 = arith.constant 0 : index
    %c0_58 = arith.constant 0 : index
    %c0_59 = arith.constant 0 : index
    %135 = vector.load %arg14[%c0_57, %c0_58, %c0_59] : memref<1x512x128xbf16, #tpu.memory_space<vmem>>, vector<1x512x128xbf16>
    %136 = vector.shape_cast %135 : vector<1x512x128xbf16> to vector<512x128xbf16>
    %cst_60 = arith.constant dense<0.000000e+00> : vector<8x128xf32>
    %137 = tpu.matmul %134, %136, %cst_60 {dimension_numbers = #tpu.dot_dimension_numbers<[1], [0], [0], [1], [0, 0, 1, 1], [], []>} : vector<8x512xbf16>, vector<512x128xbf16>, vector<8x128xf32> -> vector<8x128xf32>
    %c0_61 = arith.constant 0 : index
    %c0_62 = arith.constant 0 : index
    %c0_63 = arith.constant 0 : index
    %138 = vector.load %arg15[%c0_61, %c0_62, %c0_63] : memref<1x1x128xf32, #tpu.memory_space<vmem>>, vector<1x1x128xf32>
    %139 = vector.shape_cast %138 : vector<1x1x128xf32> to vector<1x128xf32>
    %140 = vector.broadcast %139 : vector<1x128xf32> to vector<8x128xf32>
    %141 = arith.addf %137, %140 : vector<8x128xf32>
    %142 = arith.addf %86, %141 : vector<8x128xf32>
    %143 = vector.shape_cast %142 : vector<8x128xf32> to vector<1x8x128xf32>
    %c0_64 = arith.constant 0 : index
    %c0_65 = arith.constant 0 : index
    %c0_66 = arith.constant 0 : index
    %144 = vector.load %arg16[%c0_64, %c0_65, %c0_66] : memref<1x8x128xf32, #tpu.memory_space<vmem>>, vector<1x8x128xf32>
    tpu.vector_store %arg16[%c0_64, %c0_65, %c0_66], %143 {strides = array<i32>} : memref<1x8x128xf32, #tpu.memory_space<vmem>>, vector<1x8x128xf32>,
    return
  }
  func.func @transform_0(%arg0: i32, %arg1: i32) -> (i32, i32, i32) {
    %c0_i32 = arith.constant 0 : i32
    %c0_i32_0 = arith.constant 0 : i32
    %c0_i32_1 = arith.constant 0 : i32
    return %arg0, %c0_i32, %c0_i32_0 : i32, i32, i32
  }
  func.func @transform_1(%arg0: i32, %arg1: i32) -> (i32, i32, i32) {
    %c0_i32 = arith.constant 0 : i32
    %c0_i32_0 = arith.constant 0 : i32
    %c0_i32_1 = arith.constant 0 : i32
    return %arg0, %c0_i32, %c0_i32_0 : i32, i32, i32
  }
  func.func @transform_2(%arg0: i32, %arg1: i32) -> (i32, i32, i32) {
    %c0_i32 = arith.constant 0 : i32
    %c0_i32_0 = arith.constant 0 : i32
    %c0_i32_1 = arith.constant 0 : i32
    return %arg1, %c0_i32, %c0_i32_0 : i32, i32, i32
  }
  func.func @transform_3(%arg0: i32, %arg1: i32) -> (i32, i32, i32) {
    %c0_i32 = arith.constant 0 : i32
    %c0_i32_0 = arith.constant 0 : i32
    %c0_i32_1 = arith.constant 0 : i32
    return %arg1, %c0_i32, %c0_i32_0 : i32, i32, i32
  }
  func.func @transform_4(%arg0: i32, %arg1: i32) -> (i32, i32, i32) {
    %c0_i32 = arith.constant 0 : i32
    %c0_i32_0 = arith.constant 0 : i32
    %c0_i32_1 = arith.constant 0 : i32
    return %arg1, %c0_i32, %c0_i32_0 : i32, i32, i32
  }
  func.func @transform_5(%arg0: i32, %arg1: i32) -> (i32, i32, i32) {
    %c0_i32 = arith.constant 0 : i32
    %c0_i32_0 = arith.constant 0 : i32
    %c0_i32_1 = arith.constant 0 : i32
    return %arg1, %c0_i32, %c0_i32_0 : i32, i32, i32
  }
  func.func @transform_6(%arg0: i32, %arg1: i32) -> (i32, i32, i32) {
    %c0_i32 = arith.constant 0 : i32
    %c0_i32_0 = arith.constant 0 : i32
    %c0_i32_1 = arith.constant 0 : i32
    return %arg1, %c0_i32, %c0_i32_0 : i32, i32, i32
  }
  func.func @transform_7(%arg0: i32, %arg1: i32) -> (i32, i32, i32) {
    %c0_i32 = arith.constant 0 : i32
    %c0_i32_0 = arith.constant 0 : i32
    %c0_i32_1 = arith.constant 0 : i32
    return %arg1, %c0_i32, %c0_i32_0 : i32, i32, i32
  }
  func.func @transform_8(%arg0: i32, %arg1: i32) -> (i32, i32, i32) {
    %c0_i32 = arith.constant 0 : i32
    %c0_i32_0 = arith.constant 0 : i32
    %c0_i32_1 = arith.constant 0 : i32
    return %arg1, %c0_i32, %c0_i32_0 : i32, i32, i32
  }
  func.func @transform_9(%arg0: i32, %arg1: i32) -> (i32, i32, i32) {
    %c0_i32 = arith.constant 0 : i32
    %c0_i32_0 = arith.constant 0 : i32
    %c0_i32_1 = arith.constant 0 : i32
    return %arg1, %c0_i32, %c0_i32_0 : i32, i32, i32
  }
  func.func @transform_10(%arg0: i32, %arg1: i32) -> (i32, i32, i32) {
    %c0_i32 = arith.constant 0 : i32
    %c0_i32_0 = arith.constant 0 : i32
    %c0_i32_1 = arith.constant 0 : i32
    return %arg1, %c0_i32, %c0_i32_0 : i32, i32, i32
  }
  func.func @transform_11(%arg0: i32, %arg1: i32) -> (i32, i32, i32) {
    %c0_i32 = arith.constant 0 : i32
    %c0_i32_0 = arith.constant 0 : i32
    %c0_i32_1 = arith.constant 0 : i32
    return %arg1, %c0_i32, %c0_i32_0 : i32, i32, i32
  }
  func.func @transform_12(%arg0: i32, %arg1: i32) -> (i32, i32, i32) {
    %c0_i32 = arith.constant 0 : i32
    %c0_i32_0 = arith.constant 0 : i32
    %c0_i32_1 = arith.constant 0 : i32
    return %arg1, %c0_i32, %c0_i32_0 : i32, i32, i32
  }
  func.func @transform_13(%arg0: i32, %arg1: i32) -> (i32, i32, i32) {
    %c0_i32 = arith.constant 0 : i32
    %c0_i32_0 = arith.constant 0 : i32
    %c0_i32_1 = arith.constant 0 : i32
    return %arg1, %c0_i32, %c0_i32_0 : i32, i32, i32
  }
  func.func @transform_14(%arg0: i32, %arg1: i32) -> (i32, i32, i32) {
    %c0_i32 = arith.constant 0 : i32
    %c0_i32_0 = arith.constant 0 : i32
    %c0_i32_1 = arith.constant 0 : i32
    return %arg0, %c0_i32, %c0_i32_0 : i32, i32, i32
  }
}

</mosaic_0001>

<bundles_post_ra>
// kernel: tpu_custom_call.1
= control target key start
LH: loop header
LB: loop body
LE: loop exit
PB: predicated region body
PF: predicated region fallthrough
CT: control target
= control target key end

     0   :  { %s5058_s0 = inlined_call_operand.hbm [shape: f32[2,8,128], index: 0, kind: input, shape index: {}]   ;;  %s5059_s1 = inlined_call_operand.hbm [shape: f32[2,1,8], index: 1, kind: input, shape index: {}]   ;;  %s5060_s2 = inlined_call_operand.hbm [shape: f32[2,1,128], index: 2, kind: input, shape index: {}]   ;;  %s5061_s3 = inlined_call_operand.vmem [shape: f32[2,1,128], index: 3, kind: input, shape index: {}]   ;;  %s5062_s4 = inlined_call_operand.hbm [shape: bf16[2,128,384], index: 4, kind: input, shape index: {}]   ;;  %s5063_s5 = inlined_call_operand.hbm [shape: f32[2,1,384], index: 5, kind: input, shape index: {}]   ;;  %s5064_s6 = inlined_call_operand.hbm [shape: bf16[2,128,128], index: 6, kind: input, shape index: {}]   ;;  %s5065_s7 = inlined_call_operand.hbm [shape: f32[2,1,128], index: 7, kind: input, shape index: {}]   ;;  %s5066_s8 = inlined_call_operand.hbm [shape: f32[2,1,128], index: 8, kind: input, shape index: {}]   ;;  %s5067_s9 = inlined_call_operand.hbm [shape: f32[2,1,128], index: 9, kind: input, shape index: {}]   ;;  %s5068_s10 = inlined_call_operand.hbm [shape: bf16[2,128,512], index: 10, kind: input, shape index: {}]   ;;  %s5069_s11 = inlined_call_operand.vmem [shape: f32[2,1,512], index: 11, kind: input, shape index: {}]   ;;  %s5070_s12 = inlined_call_operand.hbm [shape: bf16[2,512,128], index: 12, kind: input, shape index: {}]   ;;  %s5071_s13 = inlined_call_operand.vmem [shape: f32[2,1,128], index: 13, kind: input, shape index: {}]   ;;  %s5072_s14 = inlined_call_operand.hbm [shape: f32[2,8,128], index: 14, kind: output, shape index: {}]  }
   0x1   :  { %5102 = sst [smem:[#allocation47_spill]] %s5058_s0 }
   0x2   :  { %5103 = sst [smem:[#allocation48_spill]] %s5059_s1 }
   0x3   :  { %5104 = sst [smem:[#allocation49_spill]] %s5060_s2 }
   0x4   :  { %5105 = sst [smem:[#allocation50_spill]] %s5061_s3 }
   0x5   :  { %5106 = sst [smem:[#allocation51_spill]] %s5062_s4 }
   0x6   :  { %5107 = sst [smem:[#allocation52_spill]] %s5063_s5 }
   0x7   :  { %5108 = sst [smem:[#allocation53_spill]] %s5064_s6 }
   0x8   :  { %5109 = sst [smem:[#allocation54_spill]] %s5065_s7 }
   0x9   :  { %5110 = sst [smem:[#allocation55_spill]] %s5067_s9 }
   0xa   :  { %5111 = sst [smem:[#allocation56_spill]] %s5069_s11 }
   0xb   :  { %5112 = sst [smem:[#allocation57_spill]] %s5071_s13 }
   0xc   :  { %5113 = sst [smem:[#allocation58_spill]] %s5072_s14 }
   0xd   :  { %19 = vsyncpa [#allocation3], 0 }
   0xe   :  { %21 = vsyncpa [#allocation3 + $0x1], 0 }
   0xf   :  { %22 = vsyncpa [#allocation6], 0 }
  0x10   :  { %24 = vsyncpa [#allocation6 + $0x1], 0 }
  0x11   :  { %25 = vsyncpa [#allocation9], 0 }
  0x12   :  { %27 = vsyncpa [#allocation9 + $0x1], 0 }
  0x13   :  { %28 = vsyncpa [#allocation12], 0 }
  0x14   :  { %30 = vsyncpa [#allocation12 + $0x1], 0 }
  0x15   :  { %31 = vsyncpa [#allocation15], 0 }
  0x16   :  { %33 = vsyncpa [#allocation15 + $0x1], 0 }
  0x17   :  { %34 = vsyncpa [#allocation18], 0 }
  0x18   :  { %36 = vsyncpa [#allocation18 + $0x1], 0 }
  0x19   :  { %37 = vsyncpa [#allocation4], 0 }
  0x1a   :  { %39 = vsyncpa [#allocation4 + $0x1], 0  ;;  %s4210_s29 = smov 0   ;;  %s4212_s30 = smov 0  }
  0x1b   :  { %s4214_s15 = smov 0   ;;  %s4216_s16 = smov 0  }
  0x1c   :  { %s4218_s17 = smov 0   ;;  %s4220_s18 = smov 0  }
  0x1d   :  { %s4222_s19 = smov 0   ;;  %s4224_s20 = smov 0  }
  0x1e   :  { %s4226_s21 = smov 0   ;;  %s4228_s22 = smov 0  }
  0x1f   :  { %s4230_s23 = smov 0  }
  0x20 LB: > { %5114 = sst [smem:[#allocation29_spill]] %s4085_s30  ;;  %s4266_s24 = sadd.s32 4294967295, %s4121_s23   ;;  %s4121_s23 = sphi %s4230_s23, %s45_s23   ;;  %s4117_s22 = sphi %s4228_s22, %s5192_s22   ;;  %s4113_s21 = sphi %s4226_s21, %s5191_s21   ;;  %s4109_s20 = sphi %s4224_s20, %s5190_s20   ;;  %s4105_s19 = sphi %s4222_s19, %s5189_s19   ;;  %s4101_s18 = sphi %s4220_s18, %s5186_s18   ;;  %s4097_s17 = sphi %s4218_s17, %s5185_s17   ;;  %s4093_s16 = sphi %s4216_s16, %s5184_s16   ;;  %s4089_s15 = sphi %s4214_s15, %s5183_s15   ;;  %s4085_s30 = sphi %s4212_s30, %s5182_s30   ;;  %s4081_s29 = sphi %s4210_s29, %s5181_s29  }
  0x21   : > { %5115 = sst [smem:[#allocation30_spill]] %s4089_s15  ;;  %s2919_s25 = sadd.s32 4294967294, %s4121_s23  }
  0x22   : > { %5116 = sst [smem:[#allocation31_spill]] %s4093_s16  ;;  %s54_s26 = sadd.s32 1, %s4113_s21 }
  0x23   : > { %5117 = sst [smem:[#allocation32_spill]] %s4097_s17  ;;  %s57_s27 = sadd.s32 1, %s4117_s22 }
  0x24   : > { %5118 = sst [smem:[#allocation33_spill]] %s4101_s18  ;;  %p55_p0 = scmp.ge.s32.totalorder %s54_s26, 2 }
  0x25   : > { %5119 = sst [smem:[#allocation34_spill]] %s4105_s19  ;;  %s64_s28 = sadd.s32 1, %s4101_s18 }
  0x26   : > { %5120 = sst [smem:[#allocation35_spill]] %s4109_s20  ;;  %p71_p1 = scmp.ne.s32.totalorder %s4101_s18, %s4097_s17 }
  0x27   : > { %5121 = sst [smem:[#allocation36_spill]] %s4121_s23  ;;  %p72_p2 = scmp.eq.s32.totalorder %s4121_s23, 0 }
  0x28   : > { %5122 = sst [smem:[#allocation37_spill]] %s4266_s24  ;;  %s5194_s26 = smov (%p55_p0, %s54_s26), 0 }
  0x29   : > { %5123 = sst [smem:[#allocation38_spill]] %s5194_s26  ;;  %s5196_s27 = smov (!%p55_p0, %s57_s27), %s4117_s22 }
  0x2a   : > { %p4283_p3 = por %p72_p2, %p71_p1  ;;  %p5078_p4 = scmp.ne.s32.totalorder %s4097_s17, %s4093_s16 }
  0x2b   : > { %p59_p5 = scmp.ge.s32.totalorder %s5196_s27, 2  ;;  %p78_p6 = scmp.eq.s32.totalorder %s4266_s24, 0 }
  0x2c   : > { %s113_s20 = ssub.s32 %s4113_s21, %s5194_s26  ;;  %s116_s13 = sadd.s32 1, %s4089_s15 }
  0x2d   : > { %s5198_s27 = smov (%p59_p5, %s5196_s27), 0  ;;  %p4300_p7 = por %p78_p6, %p5078_p4 }
  0x2e   : > { %5125 = sst [smem:[#allocation39_spill]] %s5198_s27  ;;  %p114_p8 = scmp.eq.s32.totalorder %s113_s20, 0 }
  0x2f   : > { %s5126_s11 = scalar_select %p4300_p7, 1, 0 }
  0x30   : > { %s61_s26 = ssub.s32 %s4117_s22, %s5198_s27  ;;  %p123_p9 = scmp.ne.s32.totalorder %s4089_s15, %s4085_s30 }
  0x31   : > { %5127 = sst [smem:[#allocation40_spill]] %s5126_s11  ;;  %p62_p10 = scmp.eq.s32.totalorder %s61_s26, 0 }
  0x32   : > { %p129_p11 = scmp.ne.s32.totalorder %s4085_s30, %s4081_s29  ;;  %p4318_p12 = por %p123_p9, %p72_p2 }
  0x33   : > { %s4311_s3 = scalar_select %p114_p8, %s4089_s15, %s116_s13  }
  0x34   : > { %s4314_s19 = scalar_select %p62_p10, %s4101_s18, %s64_s28  }
  0x35   : > { %5128 = sst [smem:[#allocation41_spill]] %s4311_s3  ;;  %p4324_p13 = por %p129_p11, %p78_p6 }
  0x36   : > { %5129 = sst [smem:[#allocation42_spill]] %s4314_s19  ;;  %p439_p0 = scmp.eq.s32.totalorder %s4266_s24, 3 }
  0x37   : > { %s5131_s11 = scalar_select %p4324_p13, 1, 0 }
  0x38   : > { %p445_p5 = scmp.eq.s32.totalorder %s2919_s25, 3  ;;  %p3505_p4 = scmp.lt.s32.totalorder %s4121_s23, 4 }
  0x39   : > { %5132 = sst [smem:[#allocation43_spill]] %s5131_s11  ;;  %p4333_p8 = por %p439_p0, %p71_p1 }
  0x3a   : > { %p5135_p2 = scmp.ne.s32.totalorder %s4097_s17, %s4093_s16  ;;  %s4345_s20 = sand.u32 1, %s4101_s18  }
  0x3b   : > { %s5133_s13 = scalar_select %p4333_p8, 1, 0 }
  0x3c   : > { %p4340_p9 = por %p445_p5, %p5135_p2  ;;  %p4351_p6 = pnand %p3505_p4, %p4283_p3 }
  0x3d   : > { %5134 = sst [smem:[#allocation44_spill]] %s5133_s13  ;;  %s4356_s26 = sand.u32 1, %s4121_s23  }
  0x3e   : > { %s5136_s29 = scalar_select %p4340_p9, 1, 0 }
  0x3f   : > { %s5139_s1 = sld [smem:[#allocation48_spill]]  ;;  %s487_s3 = scalar_lea.vmem [#allocation5], %s4345_s20 }
  0x40   : > { %5137 = sst [smem:[#allocation45_spill]] %s5136_s29  ;;  %s494_s18 = sshll.u32 %s487_s3, 4  ;;  %s495_s18 = int_to_ptr.vmem [resolvable:$true] %s494_s18 }
  0x41   : > { %s4364_s14 = sand.u32 1, %s4089_s15   ;;  %s5083_s16 = scalar_lea.sflag [#allocation6], %s4356_s26 }
  0x42   : > { %p4375_p1 = pnand %p3505_p4, %p4318_p12  ;;  %p2934_p3 = scmp.ge.s32.totalorder %s4121_s23, 1 }
  0x43   : > { %p693_p10 = scmp.lt.s32.totalorder %s4121_s23, 5  ;;  %s3437_s3 = smul.u32 192, %s4364_s14 }
  0x44   : > { %s3438_s28 = smul.u32 192, %s4113_s21  ;;  %s5143_s4 = sld [smem:[#allocation51_spill]] }
  0x45   : > { %s490_s19 = scalar_lea.hbm %s5139_s1, %s4117_s22  ;;  %p4382_p11 = pnand %p2934_p3, %p693_p10 }
  0x46   : > { %s492_s29 = sshll.u32 %s490_s19, 4  ;;  %s5099_s13 = scalar_lea.sflag [#allocation9], %s4356_s26  ;;  %s493_s29 = int_to_ptr.hbm [resolvable:$true] %s492_s29 }
  0x47   : > { %3473 = dma.hbm_to_vmem [thread:$0]  (!%p4351_p6), %s493_s29, 16, %s495_s18, %s5083_s16  }
  0x48   : > { %s5141_s19 = scalar_select %p4382_p11, 1, 0 }
  0x49   : > { %s528_s29 = scalar_lea.vmem [#allocation8], %s3437_s3  ;;  %s4123_s23 = smov 192  }
  0x4a   : > { %5142 = sst [smem:[#allocation46_spill]] %s5141_s19  ;;  %s533_s9 = scalar_lea.hbm %s5143_s4, %s3438_s28 }
  0x4b   : > { %s536_s16 = sshll.u32 %s528_s29, 4  ;;  %s534_s15 = sshll.u32 %s533_s9, 4  ;;  %s537_s16 = int_to_ptr.vmem [resolvable:$true] %s536_s16  ;;  %s535_s15 = int_to_ptr.hbm [resolvable:$true] %s534_s15 }
  0x4c   : > { %s4124_s11 = smov 12   ;;  %s2925_s30 = sshll.u32 %s4364_s14, 6 }
  0x4d   : > { %3479 = dma.hbm_to_vmem [thread:$0]  (!%p4375_p1), %s535_s15, 3072, %s537_s16, %s5099_s13, %s4123_s23, %s4123_s23, %s4124_s11  }
  0x4e   : > { %s3338_s24 = sshll.u32 %s4113_s21, 6  ;;  %s5144_s6 = sld [smem:[#allocation53_spill]] }
  0x4f   : > { %s569_s18 = scalar_lea.vmem [#allocation11], %s2925_s30  ;;  %s5098_s4 = scalar_lea.sflag [#allocation12], %s4356_s26 }
  0x50   : > { %s577_s9 = sshll.u32 %s569_s18, 4  ;;  %s5095_s17 = smov 64   ;;  %s578_s9 = int_to_ptr.vmem [resolvable:$true] %s577_s9 }
  0x51   : > { %s5096_s19 = smov 4   ;;  %s610_s30 = scalar_lea.hbm %s5066_s8, %s4113_s21 }
  0x52   : > { %s612_s16 = sshll.u32 %s610_s30, 4  ;;  %s607_s23 = scalar_lea.vmem [#allocation14], %s4364_s14  ;;  %s613_s16 = int_to_ptr.hbm [resolvable:$true] %s612_s16 }
  0x53   : > { %s5097_s1 = scalar_lea.sflag [#allocation15], %s4356_s26  ;;  %s2928_s28 = sshll.u32 %s4364_s14, 8 }
  0x54   : > { %s574_s3 = scalar_lea.hbm %s5144_s6, %s3338_s24  ;;  %s614_s24 = sshll.u32 %s607_s23, 4  ;;  %s615_s24 = int_to_ptr.vmem [resolvable:$true] %s614_s24 }
  0x55   : > { %s575_s29 = sshll.u32 %s574_s3, 4  ;;  %s3339_s3 = sshll.u32 %s4113_s21, 8  ;;  %s576_s29 = int_to_ptr.hbm [resolvable:$true] %s575_s29 }
  0x56   : > { %3485 = dma.hbm_to_vmem [thread:$0]  (!%p4375_p1), %s576_s29, 1024, %s578_s9, %s5098_s4, %s5095_s17, %s5095_s17, %s5096_s19  }
  0x57   : > { %3491 = dma.hbm_to_vmem [thread:$0]  (!%p4375_p1), %s613_s16, 16, %s615_s24, %s5097_s1  }
  0x58   : > { %s647_s29 = scalar_lea.hbm %s5068_s10, %s3339_s3  ;;  %s642_s11 = scalar_lea.vmem [#allocation17], %s2928_s28 }
  0x59   : > { %s650_s15 = sshll.u32 %s642_s11, 4  ;;  %s648_s30 = sshll.u32 %s647_s29, 4  ;;  %s651_s15 = int_to_ptr.vmem [resolvable:$true] %s650_s15  ;;  %s649_s30 = int_to_ptr.hbm [resolvable:$true] %s648_s30 }
  0x5a   : > { %s5100_s23 = scalar_lea.sflag [#allocation18], %s4356_s26  ;;  %s4127_s17 = smov 256  }
  0x5b   : > { %s4128_s19 = smov 16   ;;  %s676_s18 = scalar_lea.hbm %s5070_s12, %s3339_s3 }
  0x5c   : > { %3497 = dma.hbm_to_vmem [thread:$0]  (!%p4375_p1), %s649_s30, 4096, %s651_s15, %s5100_s23, %s4127_s17, %s4127_s17, %s4128_s19  }
  0x5d   : > { %s671_s9 = scalar_lea.vmem [#allocation19], %s2928_s28  ;;  %s677_s11 = sshll.u32 %s676_s18, 4  ;;  %s4433_s11 = int_to_ptr.hbm [resolvable:$true] %s677_s11 }
  0x5e   : > { %s679_s1 = sshll.u32 %s671_s9, 4  ;;  %s2922_s29 = sshll.u32 %s4345_s20, 3  ;;  %s4431_s1 = int_to_ptr.vmem [resolvable:$true] %s679_s1 }
  0x5f   : > { %s2923_s4 = sshll.u32 %s4117_s22, 3  ;;  %s5145_s0 = sld [smem:[#allocation47_spill]] }
  0x60   : > { %s469_s28 = scalar_lea.vmem [#allocation2], %s2922_s29  ;;  %s466_s30 = scalar_lea.sflag [#allocation3], %s4345_s20 }
  0x61   : > { %s477_s15 = sshll.u32 %s469_s28, 4  ;;  %s5146_s2 = sld [smem:[#allocation49_spill]]  ;;  %s478_s15 = int_to_ptr.vmem [resolvable:$true] %s477_s15 }
  0x62   : > { %s504_s23 = scalar_lea.vmem [#allocation7], %s4364_s14  ;;  %s3439_s29 = smul.u32 3, %s4364_s14 }
  0x63   : > { %s511_s13 = sshll.u32 %s504_s23, 4  ;;  %s3440_s20 = smul.u32 3, %s4113_s21  ;;  %s512_s13 = int_to_ptr.vmem [resolvable:$true] %s511_s13 }
  0x64   : > { %s5148_s7 = sld [smem:[#allocation54_spill]]  ;;  %s5152_s17 = scalar_lea.sflag [#allocation12], %s4356_s26 }
  0x65   : > { %s473_s19 = scalar_lea.hbm %s5145_s0, %s2923_s4  ;;  %s5147_s4 = scalar_lea.sflag [#allocation6], %s4356_s26 }
  0x66   : > { %s475_s3 = sshll.u32 %s473_s19, 4  ;;  %s5149_s5 = sld [smem:[#allocation52_spill]]  ;;  %s476_s3 = int_to_ptr.hbm [resolvable:$true] %s475_s3 }
  0x67   : > { %3470 = dma.hbm_to_vmem [thread:$0]  (!%p4351_p6), %s476_s3, 128, %s478_s15, %s466_s30  }
  0x68   : > { %s507_s18 = scalar_lea.hbm %s5146_s2, %s4113_s21  ;;  %s550_s30 = scalar_lea.vmem [#allocation10], %s3439_s29 }
  0x69   : > { %s509_s9 = sshll.u32 %s507_s18, 4  ;;  %s558_s16 = sshll.u32 %s550_s30, 4  ;;  %s510_s9 = int_to_ptr.hbm [resolvable:$true] %s509_s9  ;;  %s559_s16 = int_to_ptr.vmem [resolvable:$true] %s558_s16 }
  0x6a   : > { %3476 = dma.hbm_to_vmem [thread:$0]  (!%p4375_p1), %s510_s9, 16, %s512_s13, %s5147_s4  }
  0x6b   : > { %s593_s19 = scalar_lea.hbm %s5148_s7, %s4113_s21  ;;  %s5150_s18 = scalar_lea.sflag [#allocation9], %s4356_s26 }
  0x6c   : > { %s595_s3 = sshll.u32 %s593_s19, 4  ;;  %s554_s23 = scalar_lea.hbm %s5149_s5, %s3440_s20  ;;  %s596_s3 = int_to_ptr.hbm [resolvable:$true] %s595_s3 }
  0x6d   : > { %s556_s24 = sshll.u32 %s554_s23, 4  ;;  %s590_s9 = scalar_lea.vmem [#allocation13], %s4364_s14  ;;  %s557_s24 = int_to_ptr.hbm [resolvable:$true] %s556_s24 }
  0x6e   : > { %3482 = dma.hbm_to_vmem [thread:$0]  (!%p4375_p1), %s557_s24, 48, %s559_s16, %s5150_s18  }
  0x6f   : > { %s597_s13 = sshll.u32 %s590_s9, 4  ;;  %s5151_s29 = sld [smem:[#allocation55_spill]]  ;;  %s598_s13 = int_to_ptr.vmem [resolvable:$true] %s597_s13 }
  0x70   : > { %3488 = dma.hbm_to_vmem [thread:$0]  (!%p4375_p1), %s596_s3, 16, %s598_s13, %s5152_s17  }
  0x71   : > { %s624_s28 = scalar_lea.vmem [#allocation16], %s4364_s14  ;;  %s5153_s23 = scalar_lea.sflag [#allocation15], %s4356_s26 }
  0x72   : > { %s631_s15 = sshll.u32 %s624_s28, 4  ;;  %s5154_s30 = smov 4   ;;  %s632_s15 = int_to_ptr.vmem [resolvable:$true] %s631_s15 }
  0x73   : > { %s5155_s16 = smov 64   ;;  %s5156_s24 = scalar_lea.sflag [#allocation18], %s4356_s26 }
  0x74   : > { %3500 = dma.hbm_to_vmem [thread:$0]  (!%p4375_p1), %s4433_s11, 4096, %s4431_s1, %s5156_s24, %s5155_s16, %s5155_s16, %s5154_s30  }
  0x75   : > { %s627_s25 = scalar_lea.hbm %s5151_s29, %s4113_s21  ;;  %697 = sbr.rel (%p4382_p11) target bundleno = 2139 (0x85b), region = 76 }
  0x76   : > { %s629_s19 = sshll.u32 %s627_s25, 4  ;;  %s5158_s9 = sld [smem:[#allocation32_spill]] (!%p4382_p11)  ;;  %s630_s19 = int_to_ptr.hbm [resolvable:$true] %s629_s19 }
  0x77   : > { %3494 = dma.hbm_to_vmem [thread:$0]  (!%p4375_p1), %s630_s19, 16, %s632_s15, %s5153_s23  }
  0x7c   : > { %s4491_s3 = sand.u32 1, %s5158_s9  }
  0x7d   : > { %s5101_s14 = sshll.u32 %s4491_s3, 3  ;;  %s700_s13 = scalar_lea.sflag [#allocation3], %s4491_s3 }
  0x7e   : > { %s4497_s20 = scalar_lea.vmem [#allocation2], %s5101_s14 }
  0x7f   : > { %4048 = dma.done.wait (%p4300_p7), %s700_s13, 128  }
  0x80   : > { %4050 = vsyncadd (%p4300_p7), %s700_s13, 4294967168  ;;  %s5160_s26 = sld [smem:[#allocation37_spill]] }
  0x86   : > { %s4504_s27 = sand.u32 1, %s5160_s26  }
  0x87   : > { %s710_s1 = scalar_lea.sflag [#allocation6], %s4504_s27 }
  0x88   : > { %4052 = dma.done.wait (%p4300_p7), %s710_s1, 16  }
  0x89   : > { %4054 = vsyncadd (%p4300_p7), %s710_s1, 4294967280  ;;  %s5161_s29 = sld [smem:[#allocation29_spill]] }
  0x8f   : > { %s4513_s17 = sand.u32 1, %s5161_s29  }
  0x90   : > { %4056 = dma.done.wait (%p4324_p13), %s710_s1, 16  }
  0x91   : > { %4058 = vsyncadd (%p4324_p13), %s710_s1, 4294967280  ;;  %s3441_s28 = smul.u32 192, %s4513_s17  ;;  %s728_s15 = scalar_lea.sflag [#allocation9], %s4504_s27 }
  0x93   : > { %s4522_s23 = scalar_lea.vmem [#allocation8], %s3441_s28 }
  0x94   : > { %4060 = dma.done.wait (%p4324_p13), %s728_s15, 3120  }
  0x95   : > { %4062 = vsyncadd (%p4324_p13), %s728_s15, 4294964176  ;;  %s3442_s30 = smul.u32 3, %s4513_s17  ;;  %s2936_s16 = sshll.u32 %s4513_s17, 6 }
  0x96   : > { %s748_s18 = scalar_lea.sflag [#allocation12], %s4504_s27  ;;  %s4533_s9 = scalar_lea.vmem [#allocation11], %s2936_s16 }
  0x97   : > { %s4530_s24 = scalar_lea.vmem [#allocation10], %s3442_s30 }
  0x98   : > { %4064 = dma.done.wait (%p4324_p13), %s748_s18, 1040  }
  0x99   : > { %4066 = vsyncadd (%p4324_p13), %s748_s18, 4294966256  ;;  %s767_s13 = scalar_lea.sflag [#allocation15], %s4504_s27 }
  0x9a   : > { %4068 = dma.done.wait (%p4324_p13), %s767_s13, 32  }
  0x9b   : > { %4070 = vsyncadd (%p4324_p13), %s767_s13, 4294967264  ;;  %s2937_s1 = sshll.u32 %s4513_s17, 8  ;;  %s785_s28 = scalar_lea.sflag [#allocation18], %s4504_s27 }
  0x9c   : > { %s4549_s15 = scalar_lea.vmem [#allocation17], %s2937_s1 }
  0x9d   : > { %4072 = dma.done.wait (%p4324_p13), %s785_s28, 8192  }
  0x9e   : > { %4074 = vsyncadd (%p4324_p13), %s785_s28, 4294959104  ;;  %s5163_s30 = sld [smem:[#allocation34_spill]]  ;;  %s4573_s5 = scalar_lea.vmem [#allocation19], %s2937_s1 }
  0x9f   : > { %s5164_s26 = sld [smem:[#allocation50_spill]]  ;;  %s5167_s6 = sshll.u32 %s4491_s3, 3 }
  0xa0   : > { %s5165_s19 = sld [smem:[#allocation56_spill]]  ;;  %s4577_s7 = scalar_lea.vmem [#allocation20], %s5167_s6 }
  0xa1   : > { %s5166_s0 = sld [smem:[#allocation57_spill]] }
  0xa4   : > { %p899_p4 = scmp.lt.s32.totalorder %s5163_s30, 1  ;;  %p2941_p7 = scmp.ne.s32.totalorder %s5163_s30, 0 }
  0xa6   : > { %s4557_s16 = scalar_select %p899_p4, %s5163_s30, 1 }
  0xa7   : > { %913 = sbr.rel (%p2941_p7) target bundleno = 174 (0xae), region = 124 }
  0xa8   : > { %s901_s27 = scalar_lea.vmem %s5164_s26, %s4557_s16  ;;  %s2940_s29 = sshll.u32 %s4557_s16, 2 }
  0xa9   : > { %s4567_s14 = scalar_lea.vmem %s5165_s19, %s2940_s29  ;;  %s908_s2 = scalar_lea.vmem %s5166_s0, %s4557_s16 }
  0xac   : > { %v914_v0 = vld [vmem:[%s4497_s20] sm:$0xff] }
  0xad   : > { %915 = vst [vmem:[%s4577_s7] sm:$0xff] %v914_v0 }
  0xae PF: > { %v4129_v2 = vmov 128.0   ;;  %v3028_v3 = vld [vmem:[%s4522_s23 + $0xa8] sm:$0xf]  ;;  %v3363_v4 = vld [vmem:[%s4522_s23 + $0xb0] sm:$0xf0]  ;;  %s5168_s0 = scalar_lea.vmem [#allocation7], %s4513_s17 }
  0xaf   : > { %3614 = vrcp.f32 %v4129_v2  ;;  %v3362_v5 = vld [vmem:[%s4522_s23 + $0xac] sm:$0xf]  ;;  %v3029_v6 = vor.u32 %v3363_v4, %v3028_v3  ;;  %v3030_v7 = vld [vmem:[%s4522_s23 + $0xb4] sm:$0xf0]  ;;  %v3036_v8 = vld [vmem:[%s4522_s23 + $0xb0] sm:$0xf] }
  0xb0   : > { %v3364_v9 = vld [vmem:[%s4522_s23 + $0xb8] sm:$0xf0]  ;;  %v3033_v10 = vor.u32 %v3362_v5, %v3030_v7  ;;  %v3016_v22 = vld [vmem:[%s4522_s23 + $0x90] sm:$0xf]  ;;  %v3359_v24 = vld [vmem:[%s4522_s23 + $0x94] sm:$0xf] }
  0xb1   : > { %v3037_v11 = vor.u32 %v3364_v9, %v3036_v8  ;;  %1123 = vmatpush.bf16.msra.mxu0 %v3029_v6  ;;  %v3360_v23 = vld [vmem:[%s4522_s23 + $0x98] sm:$0xf0]  ;;  %v3018_v26 = vld [vmem:[%s4522_s23 + $0x9c] sm:$0xf0]  ;;  %v3024_v27 = vld [vmem:[%s4522_s23 + $0x98] sm:$0xf] }
  0xb2   : > { %1136 = vmatpush.bf16.msra.mxu1 %v3033_v10  ;;  %v3017_v25 = vor.u32 %v3360_v23, %v3016_v22  ;;  %v3361_v28 = vld [vmem:[%s4522_s23 + $0xa0] sm:$0xf0]  ;;  %v3021_v29 = vor.u32 %v3359_v24, %v3018_v26  ;;  %v3004_v31 = vld [vmem:[%s4522_s23 + $0x78] sm:$0xf]  ;;  %v3356_v33 = vld [vmem:[%s4522_s23 + $0x7c] sm:$0xf] }
  0xb3   : > { %1149 = vmatpush.bf16.msra.mxu2 %v3037_v11  ;;  %v3025_v30 = vor.u32 %v3361_v28, %v3024_v27  ;;  %v3357_v32 = vld [vmem:[%s4522_s23 + $0x80] sm:$0xf0]  ;;  %v3006_v35 = vld [vmem:[%s4522_s23 + $0x84] sm:$0xf0]  ;;  %v3012_v36 = vld [vmem:[%s4522_s23 + $0x80] sm:$0xf] }
  0xb4   : > { %v916_v1 = vld [vmem:[%s4577_s7] sm:$0xff]  ;;  %v3005_v34 = vor.u32 %v3357_v32, %v3004_v31  ;;  %v3009_v38 = vor.u32 %v3356_v33, %v3006_v35  ;;  %v2992_v40 = vld [vmem:[%s4522_s23 + $0x60] sm:$0xf]  ;;  %v3353_v42 = vld [vmem:[%s4522_s23 + $0x64] sm:$0xf]  ;;  %s4130_s19 = smov 32  }
  0xb5   : > { %919 = vadd.xlane.f32.xlu0 %v916_v1  ;;  %v3615_v12 = vpop.eup %3614  ;;  %1124 = vmatpush.bf16.msra.mxu0 %v3017_v25  ;;  %v3358_v37 = vld [vmem:[%s4522_s23 + $0x88] sm:$0xf0]  ;;  %v2994_v44 = vld [vmem:[%s4522_s23 + $0x6c] sm:$0xf0]  ;;  %v3000_v45 = vld [vmem:[%s4522_s23 + $0x68] sm:$0xf] }
  0xb6   : > { %v922_v13 = vmul.f32 128.0, %v3615_v12  ;;  %vm926_vm0 = vweird.f32 %v3615_v12  ;;  %1137 = vmatpush.bf16.msra.mxu1 %v3021_v29  ;;  %v3013_v39 = vor.u32 %v3358_v37, %v3012_v36  ;;  %v3354_v41 = vld [vmem:[%s4522_s23 + $0x68] sm:$0xf0]  ;;  %v3355_v46 = vld [vmem:[%s4522_s23 + $0x70] sm:$0xf0]  ;;  %v2997_v47 = vor.u32 %v3353_v42, %v2994_v44  ;;  %s4132_s4 = smov 64  }
  0xb7   : > { %1150 = vmatpush.bf16.msra.mxu2 %v3025_v30  ;;  %v2993_v43 = vor.u32 %v3354_v41, %v2992_v40  ;;  %v3001_v48 = vor.u32 %v3355_v46, %v3000_v45  ;;  %v2980_v49 = vld [vmem:[%s4522_s23 + $0x48] sm:$0xf]  ;;  %v3351_v50 = vld [vmem:[%s4522_s23 + $0x50] sm:$0xf0]  ;;  %v3350_v51 = vld [vmem:[%s4522_s23 + $0x4c] sm:$0xf] }
  0xb8   : > { %v923_v14 = vsub.f32 1.0, %v922_v13  ;;  %v2981_v52 = vor.u32 %v3351_v50, %v2980_v49  ;;  %v2982_v53 = vld [vmem:[%s4522_s23 + $0x54] sm:$0xf0]  ;;  %v2988_v54 = vld [vmem:[%s4522_s23 + $0x50] sm:$0xf]  ;;  %vm1174_vm4 = vcmask 1047556  }
  0xb9   : > { %1125 = vmatpush.bf16.msra.mxu0 %v3005_v34  ;;  %v3352_v55 = vld [vmem:[%s4522_s23 + $0x58] sm:$0xf0]  ;;  %v2985_v56 = vor.u32 %v3350_v51, %v2982_v53  ;;  %v2968_v58 = vld [vmem:[%s4522_s23 + $0x30] sm:$0xf]  ;;  %v3347_v60 = vld [vmem:[%s4522_s23 + $0x34] sm:$0xf] }
  0xba   : > { %v924_v15 = vmul.f32 %v3615_v12, %v923_v14  ;;  %1138 = vmatpush.bf16.msra.mxu1 %v3009_v38  ;;  %v2989_v57 = vor.u32 %v3352_v55, %v2988_v54  ;;  %v3348_v59 = vld [vmem:[%s4522_s23 + $0x38] sm:$0xf0]  ;;  %v2970_v62 = vld [vmem:[%s4522_s23 + $0x3c] sm:$0xf0]  ;;  %v2976_v63 = vld [vmem:[%s4522_s23 + $0x38] sm:$0xf] }
  0xbb   : > { %1151 = vmatpush.bf16.msra.mxu2 %v3013_v39  ;;  %v2969_v61 = vor.u32 %v3348_v59, %v2968_v58  ;;  %v3349_v0 = vld [vmem:[%s4522_s23 + $0x40] sm:$0xf0]  ;;  %v2956_v3 = vld [vmem:[%s4522_s23 + $0x18] sm:$0xf]  ;;  %v3344_v5 = vld [vmem:[%s4522_s23 + $0x1c] sm:$0xf] }
  0xbc   : > { %v925_v16 = vadd.f32 %v3615_v12, %v924_v15  ;;  %v2977_v2 = vor.u32 %v3349_v0, %v2976_v63  ;;  %v3345_v4 = vld [vmem:[%s4522_s23 + $0x20] sm:$0xf0]  ;;  %v2958_v7 = vld [vmem:[%s4522_s23 + $0x24] sm:$0xf0]  ;;  %v2964_v8 = vld [vmem:[%s4522_s23 + $0x20] sm:$0xf] }
  0xbd   : > { %1126 = vmatpush.bf16.msra.mxu0 %v2993_v43  ;;  %v2957_v6 = vor.u32 %v3345_v4, %v2956_v3  ;;  %v3346_v9 = vld [vmem:[%s4522_s23 + $0x28] sm:$0xf0]  ;;  %v2961_v10 = vor.u32 %v3344_v5, %v2958_v7  ;;  %v3341_v14 = vld [vmem:[%s4522_s23 + $0x4] sm:$0xf]  ;;  %v4133_v51 = vmov 1983009808  }
  0xbe   : > { %v4589_v17 = vsel %vm926_vm0, %v3615_v12, %v925_v16  ;;  %1139 = vmatpush.bf16.msra.mxu1 %v2997_v47  ;;  %v2965_v11 = vor.u32 %v3346_v9, %v2964_v8  ;;  %v2944_v12 = vld [vmem:[%s4522_s23] sm:$0xf]  ;;  %v3342_v13 = vld [vmem:[%s4522_s23 + $0x8] sm:$0xf0]  ;;  %v2946_v16 = vld [vmem:[%s4522_s23 + $0xc] sm:$0xf0] }
  0xbf   : > { %1152 = vmatpush.bf16.msra.mxu2 %v3001_v48  ;;  %v2945_v15 = vor.u32 %v3342_v13, %v2944_v12  ;;  %v3607_v32 = vld [vmem:[%s5168_s0] ss:$0 sm:$0xff]  ;;  %v4648_v39 = vld [vmem:[%s4530_s24] sm:$0x7]  ;;  %vm1532_vm5 = vcmask 261120   ;;  %s5170_s24 = scalar_lea.vmem [#allocation5], %s4491_s3 }
  0xc0   : > { %v3608_v35 = vld [vmem:[%s901_s27] ss:$0 sm:$0xff]  ;;  %v989_v40 = vperm.slane %v4648_v39, 0  ;;  %v990_v41 = vperm.slane %v4648_v39, 1  ;;  %vm1617_vm6 = vcmask 64512   ;;  %vm1673_vm7 = vcmask 1043456  }
  0xc1   : > { %1127 = vmatpush.bf16.msra.mxu0 %v2981_v52  ;;  %v1179_v52 = vunpack.c.l.s4 %v4133_v51  ;;  %vm1870_vm8 = vcmask 523264   ;;  %vm1872_vm9 = vcmask 785408   ;;  %s5171_s26 = scalar_lea.vmem [#allocation13], %s4513_s17  ;;  %s5173_s1 = scalar_lea.vmem [#allocation16], %s4513_s17 }
  0xc2   : > { %1140 = vmatpush.bf16.msra.mxu1 %v2985_v56  ;;  %s5176_s13 = sld [smem:[#allocation58_spill]]  ;;  %s2609_s28 = sshll.u32 %s4577_s7, 4  ;;  %s2610_s28 = int_to_ptr.vmem [resolvable:$true] %s2609_s28 }
  0xc3   : > { %1153 = vmatpush.bf16.msra.mxu2 %v2989_v57  ;;  %v4661_v57 = vunpack.c.0.s8 %v1179_v52 }
  0xc5   : > { %1128 = vmatpush.bf16.msra.mxu0 %v2969_v61 }
  0xc7   : > { %1154 = vmatpush.bf16.msra.mxu2 %v2977_v2 }
  0xc9   : > { %1129 = vmatpush.bf16.msra.mxu0 %v2957_v6 }
  0xcb   : > { %1155 = vmatpush.bf16.msra.mxu2 %v2965_v11 }
  0xcd   : > { %1130 = vmatpush.bf16.msra.mxu0 %v2945_v15 }
 0x128   : > { %v920_v18 = vpop.xlane.xlu0 %919 }
 0x129   : > { %v928_v19 = vmul.f32 %v4589_v17, %v920_v18  ;;  %v2952_v18 = vld [vmem:[%s4522_s23 + $0x8] sm:$0xf] }
 0x12b   : > { %v4592_v20 = vsub.f32 %v916_v1, %v928_v19  ;;  %v2973_v1 = vor.u32 %v3347_v60, %v2970_v62  ;;  %v3343_v19 = vld [vmem:[%s4522_s23 + $0x10] sm:$0xf0]  ;;  %s4131_s23 = smov 96   ;;  %v4134_v60 = vmov 1934713408  }
 0x12c   : > { %v2953_v22 = vor.u32 %v3343_v19, %v2952_v18  ;;  %v1203_v61 = vunpack.c.l.s4 %v4134_v60 }
 0x12d   : > { %v930_v21 = vmul.f32 %v4592_v20, %v4592_v20  ;;  %1141 = vmatpush.bf16.msra.mxu1 %v2973_v1 }
 0x12e   : > { %1156 = vmatpush.bf16.msra.mxu2 %v2953_v22  ;;  %v4666_v4 = vunpack.c.0.s8 %v1203_v61 }
 0x12f   : > { %931 = vadd.xlane.f32.xlu0 %v930_v21  ;;  %v2949_v21 = vor.u32 %v3341_v14, %v2946_v16 }
 0x131   : > { %1142 = vmatpush.bf16.msra.mxu1 %v2961_v10 }
 0x135   : > { %1143 = vmatpush.bf16.msra.mxu1 %v2949_v21 }
 0x1a2   : > { %v932_v23 = vpop.xlane.xlu0 %931 }
 0x1a3   : > { %v933_v24 = vmul.f32 %v932_v23, %v4589_v17 }
 0x1a5   : > { %v934_v25 = vadd.f32 1e-05, %v933_v24 }
 0x1a7   : > { %3616 = vrsqrt.f32 %v934_v25  ;;  %vm941_vm2 = vweird.f32 %v934_v25 }
 0x1ad   : > { %v3617_v26 = vpop.eup %3616 }
 0x1ae   : > { %v936_v27 = vmul.f32 %v3617_v26, %v934_v25  ;;  %vm942_vm1 = vweird.f32 %v3617_v26 }
 0x1af   : > { %vm943_vm3 = vmor %vm941_vm2, %vm942_vm1 }
 0x1b0   : > { %v937_v28 = vmul.f32 %v3617_v26, %v936_v27 }
 0x1b2   : > { %v938_v29 = vmul.f32 0.5, %v937_v28 }
 0x1b4   : > { %v939_v30 = vsub.f32 1.5, %v938_v29 }
 0x1b6   : > { %v940_v31 = vmul.f32 %v3617_v26, %v939_v30 }
 0x1b8   : > { %v944_v33 = vsel %vm943_vm3, %v3617_v26, %v940_v31 }
 0x1b9   : > { %v945_v34 = vmul.f32 %v944_v33, %v4592_v20 }
 0x1bb   : > { %v949_v36 = vmul.f32 %v3607_v32, %v945_v34 }
 0x1bd   : > { %v953_v37 = vadd.f32 %v3608_v35, %v949_v36 }
 0x1bf   : > { %v954_v38 = vpack.c.bf16 %v953_v37, %v953_v37 }
 0x1c1   : > { %1131 = vmatmul.bf16.vlgmr.msra.gmra.mxu0 %v954_v38  ;;  %1144 = vmatmul.bf16.vlgmr.msra.gmra.mxu1 %v954_v38 }
 0x1c2   : > { %1157 = vmatmul.bf16.vlgmr.msra.gmra.mxu2 %v954_v38 }
 0x23e   : > { %v1132_v42 = vpop.f32.mrf.mxu0  ;;  %v1145_v43 = vpop.f32.mrf.mxu1 }
 0x23f   : > { %v1133_v20 = vadd.f32 %v1132_v42, %v989_v40  ;;  %v1146_v44 = vadd.f32 %v1145_v43, %v990_v41 }
 0x241   : > { %v1162_v45 = vmul.f32 0.17677669, %v1133_v20  ;;  %1291 = vrot.lane.b32.xlu2 %v1146_v44, %s4130_s19  ;;  %1285 = vrot.lane.b32.xlu1 %v1146_v44, %s4131_s23  ;;  %v1296_v0 = vrot.slane %v1146_v44, 4 }
 0x243   : > { %1167 = vrot.lane.b32.xlu0 %v1162_v45, %s4132_s4  ;;  %v1176_v2 = vrot.slane %v1162_v45, 4 }
 0x245   : > { %v4655_v46 = vpop.f32.mrf.mxu2 }
 0x246   : > { %v1134_v47 = vpop.f32.mrf.mxu0  ;;  %v1147_v48 = vpop.f32.mrf.mxu1 }
 0x249   : > { %1288 = vrot.lane.b32.xlu1 %v1146_v44, %s4132_s4  ;;  %1164 = vrot.lane.b32.xlu2 %v1162_v45, %s4131_s23 }
 0x24d   : > { %v1160_v49 = vpop.f32.mrf.mxu2 }
 0x251   : > { %1170 = vrot.lane.b32.xlu1 %v1162_v45, %s4130_s19 }
 0x29b   : > { %v1292_v50 = vpop.permute.xlu2 %1291 }
 0x29c   : > { %v1306_v55 = vrot.slane %v1292_v50, 4 }
 0x2a3   : > { %v1165_v16 = vpop.permute.xlu2 %1164 }
 0x2a4   : > { %v1188_v28 = vrot.slane %v1165_v16, 4 }
 0x2b3   : > { %v1286_v53 = vpop.permute.xlu1 %1285 }
 0x2b4   : > { %v1308_v54 = vrot.slane %v1286_v53, 4  ;;  %v1307_v59 = vsel %vm1174_vm4, %v1306_v55, %v1286_v53 }
 0x2b5   : > { %v1168_v58 = vpop.permute.xlu0 %1167  ;;  %v1313_v1 = vperm.slane %v1307_v59, %v4661_v57 }
 0x2b6   : > { %v1309_v56 = vsel %vm1174_vm4, %v1292_v50, %v1308_v54  ;;  %v1173_v63 = vrot.slane %v1168_v58, 4  ;;  %v1177_v8 = vsel %vm1174_vm4, %v1168_v58, %v1176_v2 }
 0x2b7   : > { %v1317_v62 = vperm.slane %v1309_v56, %v4661_v57  ;;  %v1318_v12 = vrot.slane %v1313_v1, 4  ;;  %v1185_v18 = vperm.slane %v1177_v8, %v4661_v57 }
 0x2b8   : > { %v1175_v10 = vsel %vm1174_vm4, %v1173_v63, %v1162_v45 }
 0x2b9   : > { %v1330_v7 = vrot.slane %v1317_v62, 4  ;;  %v1181_v21 = vperm.slane %v1175_v10, %v4661_v57  ;;  %v1212_v35 = vrot.slane %v1185_v18, 4 }
 0x2bb   : > { %v1289_v3 = vpop.permute.xlu1 %1288  ;;  %v1200_v34 = vrot.slane %v1181_v21, 4 }
 0x2bc   : > { %v1294_v5 = vrot.slane %v1289_v3, 4  ;;  %v1297_v6 = vsel %vm1174_vm4, %v1289_v3, %v1296_v0 }
 0x2bd   : > { %v1305_v9 = vperm.slane %v1297_v6, %v4661_v57 }
 0x2be   : > { %v1295_v11 = vsel %vm1174_vm4, %v1294_v5, %v1146_v44 }
 0x2bf   : > { %v1301_v13 = vperm.slane %v1295_v11, %v4661_v57  ;;  %v1331_v14 = vsel %vm1174_vm4, %v1330_v7, %v1305_v9  ;;  %v1332_v15 = vrot.slane %v1305_v9, 4 }
 0x2c0   : > { %v1337_v19 = vperm.slane %v1331_v14, %v4666_v4 }
 0x2c1   : > { %v1319_v22 = vsel %vm1174_vm4, %v1318_v12, %v1301_v13  ;;  %v1320_v23 = vrot.slane %v1301_v13, 4  ;;  %v1333_v24 = vsel %vm1174_vm4, %v1317_v62, %v1332_v15 }
 0x2c2   : > { %v1325_v25 = vperm.slane %v1319_v22, %v4666_v4  ;;  %v1341_v26 = vperm.slane %v1333_v24, %v4666_v4  ;;  %v1346_v27 = vrot.slane %v1337_v19, 4 }
 0x2c3   : > { %v1321_v29 = vsel %vm1174_vm4, %v1313_v1, %v1320_v23  ;;  %v1171_v30 = vpop.permute.xlu1 %1170 }
 0x2c4   : > { %v1329_v31 = vperm.slane %v1321_v29, %v4666_v4  ;;  %v1342_v32 = vrot.slane %v1325_v25, 4  ;;  %v1348_v33 = vrot.slane %v1341_v26, 4  ;;  %v1186_v36 = vrot.slane %v1171_v30, 4 }
 0x2c5   : > { %v1189_v37 = vsel %vm1174_vm4, %v1171_v30, %v1188_v28  ;;  %v1347_v40 = vsel %vm1174_vm4, 0.0, %v1346_v27 }
 0x2c6   : > { %v1344_v38 = vrot.slane %v1329_v31, 4  ;;  %v1349_v41 = vsel %vm1174_vm4, 0.0, %v1348_v33  ;;  %v1361_v42 = vsel %vm1174_vm4, %v1348_v33, %v1337_v19  ;;  %v1343_v43 = vsel %vm1174_vm4, 0.0, %v1342_v32 }
 0x2c7   : > { %v1366_v20 = vrot.slane %v1349_v41, 4  ;;  %v1187_v44 = vsel %vm1174_vm4, %v1186_v36, %v1165_v16  ;;  %v1197_v45 = vperm.slane %v1189_v37, %v4661_v57  ;;  %v1365_v48 = vperm.slane %v1361_v42, %v4661_v57 }
 0x2c8   : > { %v1345_v47 = vsel %vm1174_vm4, 0.0, %v1344_v38  ;;  %v1193_v49 = vperm.slane %v1187_v44, %v4661_v57  ;;  %v1350_v50 = vsel %vm1174_vm4, %v1344_v38, %v1325_v25 }
 0x2c9   : > { %v1355_v51 = vrot.slane %v1345_v47, 4  ;;  %v1367_v52 = vsel %vm1174_vm4, %v1366_v20, %v1347_v40  ;;  %v1210_v53 = vrot.slane %v1197_v45, 4  ;;  %v1213_v54 = vsel %vm1174_vm4, %v1197_v45, %v1212_v35 }
 0x2ca   : > { %v1371_v55 = vperm.slane %v1367_v52, %v4661_v57  ;;  %v1198_v56 = vrot.slane %v1193_v49, 4  ;;  %v1201_v58 = vsel %vm1174_vm4, %v1193_v49, %v1200_v34  ;;  %v1221_v59 = vperm.slane %v1213_v54, %v4666_v4 }
 0x2cb   : > { %v1209_v60 = vperm.slane %v1201_v58, %v4666_v4  ;;  %v1211_v61 = vsel %vm1174_vm4, %v1210_v53, %v1185_v18  ;;  %v1354_v62 = vperm.slane %v1350_v50, %v4661_v57  ;;  %v1356_v63 = vsel %vm1174_vm4, %v1355_v51, %v1343_v43 }
 0x2cc   : > { %v1199_v0 = vsel %vm1174_vm4, %v1198_v56, %v1181_v21  ;;  %v1217_v1 = vperm.slane %v1211_v61, %v4666_v4  ;;  %v1228_v2 = vrot.slane %v1221_v59, 4  ;;  %v1360_v3 = vperm.slane %v1356_v63, %v4661_v57 }
 0x2cd   : > { %v1205_v5 = vperm.slane %v1199_v0, %v4666_v4  ;;  %v1224_v6 = vrot.slane %v1209_v60, 4  ;;  %v1374_v7 = vrot.slane %v1354_v62, 4  ;;  %v1384_v8 = vrot.slane %v1371_v55, 4 }
 0x2ce   : > { %v1226_v9 = vrot.slane %v1217_v1, 4  ;;  %v1229_v10 = vsel %vm1174_vm4, 0.0, %v1228_v2  ;;  %v1241_v11 = vsel %vm1174_vm4, %v1228_v2, %v1217_v1  ;;  %v1372_v12 = vrot.slane %v1360_v3, 4 }
 0x2cf   : > { %v1222_v13 = vrot.slane %v1205_v5, 4  ;;  %v1225_v14 = vsel %vm1174_vm4, 0.0, %v1224_v6  ;;  %v1245_v15 = vperm.slane %v1241_v11, %v4661_v57  ;;  %v1246_v16 = vrot.slane %v1229_v10, 4 }
 0x2d0   : > { %v1227_v18 = vsel %vm1174_vm4, 0.0, %v1226_v9  ;;  %v1235_v19 = vrot.slane %v1225_v14, 4  ;;  %v1373_v21 = vsel %vm1174_vm4, %v1372_v12, %v1354_v62  ;;  %v1385_v22 = vsel %vm1174_vm4, %v1384_v8, %v1365_v48 }
 0x2d1   : > { %v1223_v23 = vsel %vm1174_vm4, 0.0, %v1222_v13  ;;  %v1247_v24 = vsel %vm1174_vm4, %v1246_v16, %v1227_v18  ;;  %v1266_v25 = vrot.slane %v1245_v15, 4  ;;  %v1379_v26 = vperm.slane %v1373_v21, %v4666_v4  ;;  %v3609_v16 = vld [vmem:[%s5170_s24] ss:$0 sm:$0xff] }
 0x2d2   : > { %v1251_v27 = vperm.slane %v1247_v24, %v4661_v57  ;;  %v1391_v28 = vperm.slane %v1385_v22, %v4666_v4  ;;  %v1375_v29 = vsel %vm1174_vm4, %v1360_v3, %v1374_v7  ;;  %v1386_v30 = vrot.slane %v1365_v48, 4 }
 0x2d3   : > { %v1383_v31 = vperm.slane %v1375_v29, %v4666_v4  ;;  %v1398_v32 = vrot.slane %v1379_v26, 4  ;;  %v1230_v33 = vsel %vm1174_vm4, %v1224_v6, %v1205_v5  ;;  %v1236_v34 = vsel %vm1174_vm4, %v1235_v19, %v1223_v23 }
 0x2d4   : > { %v1396_v35 = vrot.slane %v1391_v28, 4  ;;  %v1387_v36 = vsel %vm1174_vm4, %v1371_v55, %v1386_v30  ;;  %v1234_v37 = vperm.slane %v1230_v33, %v4661_v57  ;;  %v1240_v38 = vperm.slane %v1236_v34, %v4661_v57 }
 0x2d5   : > { %v1395_v40 = vperm.slane %v1387_v36, %v4666_v4  ;;  %v1402_v41 = vrot.slane %v1383_v31, 4  ;;  %v1399_v42 = vsel %vm1174_vm4, %v1391_v28, %v1398_v32  ;;  %v1264_v43 = vrot.slane %v1251_v27, 4 }
 0x2d6   : > { %v1397_v20 = vsel %vm1174_vm4, %v1396_v35, %v1379_v26  ;;  %v1529_v44 = vpack.c.bf16 %v1399_v42, %v1399_v42  ;;  %v1252_v45 = vrot.slane %v1240_v38, 4  ;;  %v1254_v47 = vrot.slane %v1234_v37, 4 }
 0x2d7   : > { %v1528_v48 = vpack.c.bf16 %v1397_v20, %v1397_v20  ;;  %v1400_v49 = vrot.slane %v1395_v40, 4  ;;  %v1403_v50 = vsel %vm1174_vm4, %v1395_v40, %v1402_v41  ;;  %v1265_v51 = vsel %vm1174_vm4, %v1264_v43, %v1245_v15 }
 0x2d8   : > { %v1531_v52 = vpack.c.bf16 %v1403_v50, %v1403_v50  ;;  %v1556_v53 = vsel %vm1532_vm5, %v1529_v44, 0  ;;  %v1253_v54 = vsel %vm1174_vm4, %v1252_v45, %v1234_v37  ;;  %v1271_v55 = vperm.slane %v1265_v51, %v4666_v4 }
 0x2d9   : > { %v1537_v56 = vsel %vm1532_vm5, %v1528_v48, 0  ;;  %v1259_v58 = vperm.slane %v1253_v54, %v4666_v4  ;;  %v1255_v59 = vsel %vm1174_vm4, %v1240_v38, %v1254_v47  ;;  %v1267_v60 = vsel %vm1174_vm4, %v1251_v27, %v1266_v25 }
 0x2da   : > { %1546 = vmatpush.bf16.xpose.msra.mxu3 %v1537_v56  ;;  %v1594_v61 = vsel %vm1532_vm5, %v1531_v52, 0  ;;  %v1276_v62 = vrot.slane %v1271_v55, 4  ;;  %v1263_v63 = vperm.slane %v1255_v59, %v4666_v4  ;;  %v1401_v0 = vsel %vm1174_vm4, %v1400_v49, %v1383_v31 }
 0x2db   : > { %1603 = vmatpush.bf16.xpose.msrb.mxu0 %v1594_v61  ;;  %v1275_v2 = vperm.slane %v1267_v60, %v4666_v4  ;;  %v1530_v5 = vpack.c.bf16 %v1401_v0, %v1401_v0  ;;  %v1278_v10 = vrot.slane %v1259_v58, 4  ;;  %v991_v31 = vperm.slane %v4648_v39, 2 }
 0x2dc   : > { %v1277_v1 = vsel %vm1174_vm4, %v1276_v62, %v1259_v58  ;;  %v1282_v3 = vrot.slane %v1263_v63, 4 }
 0x2dd   : > { %v1524_v7 = vpack.c.bf16 %v1277_v1, %v1277_v1  ;;  %v1575_v9 = vsel %vm1532_vm5, %v1530_v5, 0  ;;  %v1279_v11 = vsel %vm1174_vm4, %v1271_v55, %v1278_v10  ;;  %v1280_v13 = vrot.slane %v1275_v2, 4 }
 0x2de   : > { %v1283_v6 = vsel %vm1174_vm4, %v1275_v2, %v1282_v3  ;;  %v1525_v12 = vpack.c.bf16 %v1279_v11, %v1279_v11  ;;  %v1159_v32 = vadd.f32 %v4655_v46, %v991_v31 }
 0x2df   : > { %v1527_v8 = vpack.c.bf16 %v1283_v6, %v1283_v6  ;;  %v1281_v14 = vsel %vm1174_vm4, %v1280_v13, %v1263_v63 }
 0x2e0   : > { %v1526_v15 = vpack.c.bf16 %v1281_v14, %v1281_v14  ;;  %v1416_v0 = vrot.slane %v1159_v32, 4 }
 0x2e1   : > { %3038 = vmatmul.msk.bf16.vlgmr.msra.gmra.mxu3 %vm1532_vm5, %v1524_v7 }
 0x2e2   : > { %1565 = vmatpush.bf16.xpose.msrb.mxu3 %v1556_v53  ;;  %3041 = vmatmul.msk.bf16.vlgmr.msrb.gmra.mxu0 %vm1532_vm5, %v1527_v8 }
 0x2ea   : > { %1584 = vmatpush.bf16.xpose.msra.mxu3 %v1575_v9 }
 0x2f1   : > { %3039 = vmatmul.msk.bf16.vlgmr.msrb.gmra.mxu3 %vm1532_vm5, %v1525_v12 }
 0x301   : > { %3040 = vmatmul.msk.bf16.vlgmr.msra.gmra.mxu3 %vm1532_vm5, %v1526_v15 }
 0x35f   : > { %v1605_v18 = vpop.f32.mrf.mxu0 }
 0x360   : > { %v1616_v19 = vadd.f32 %v3609_v16, %v1605_v18 }
 0x362   : > { %v1627_v21 = vsel %vm1617_vm6, %v1616_v19, -inf }
 0x363   : > { %1628 = vmax.xlane.f32.xlu2 %v1627_v21 }
 0x364   : > { %v1548_v22 = vpop.f32.mrf.mxu3 }
 0x365   : > { %v1613_v23 = vadd.f32 %v3609_v16, %v1548_v22 }
 0x367   : > { %v1607_v24 = vpop.f32.mrf.mxu0  ;;  %v1618_v25 = vsel %vm1617_vm6, %v1613_v23, -inf }
 0x36b   : > { %1619 = vmax.xlane.f32.xlu2 %v1618_v25 }
 0x36c   : > { %v1550_v26 = vpop.f32.mrf.mxu3 }
 0x374   : > { %v1567_v27 = vpop.f32.mrf.mxu3 }
 0x375   : > { %v1614_v28 = vadd.f32 %v3609_v16, %v1567_v27 }
 0x377   : > { %v1621_v29 = vsel %vm1617_vm6, %v1614_v28, -inf }
 0x378   : > { %1622 = vmax.xlane.f32.xlu0 %v1621_v29 }
 0x37c   : > { %v1569_v30 = vpop.f32.mrf.mxu3 }
 0x383   : > { %1405 = vrot.lane.b32.xlu2 %v1159_v32, %s4131_s23 }
 0x384   : > { %v1586_v33 = vpop.f32.mrf.mxu3 }
 0x385   : > { %v1615_v34 = vadd.f32 %v3609_v16, %v1586_v33 }
 0x387   : > { %v1624_v35 = vsel %vm1617_vm6, %v1615_v34, -inf }
 0x388   : > { %1625 = vmax.xlane.f32.xlu1 %v1624_v35 }
 0x38c   : > { %1411 = vrot.lane.b32.xlu0 %v1159_v32, %s4130_s19  ;;  %v1588_v36 = vpop.f32.mrf.mxu3 }
 0x3a1   : > { %1408 = vrot.lane.b32.xlu1 %v1159_v32, %s4132_s4 }
 0x3d6   : > { %v1629_v37 = vpop.xlane.xlu2 %1628 }
 0x3d7   : > { %v1633_v41 = vsub.f32 %v1616_v19, %v1629_v37 }
 0x3d9   : > { %v1640_v39 = vmul.f32 1.442695, %v1633_v41 }
 0x3de   : > { %v1620_v38 = vpop.xlane.xlu2 %1619 }
 0x3df   : > { %v1630_v40 = vsub.f32 %v1613_v23, %v1620_v38 }
 0x3e1   : > { %v1634_v42 = vmul.f32 1.442695, %v1630_v40 }
 0x3e3   : > { %3618 = vpow2.f32 %v1634_v42 }
 0x3e4   : > { %3620 = vpow2.f32 %v1640_v39 }
 0x3e6   : > { %v1406_v56 = vpop.permute.xlu2 %1405 }
 0x3e7   : > { %v1428_v59 = vrot.slane %v1406_v56, 4 }
 0x3e9   : > { %v4763_v46 = vpop.eup %3618 }
 0x3ea   : > { %v1642_v43 = vsel %vm1617_vm6, %v4763_v46, 0.0  ;;  %v4767_v47 = vpop.eup %3620 }
 0x3eb   : > { %1643 = vadd.xlane.f32.xlu2 %v1642_v43  ;;  %v1623_v20 = vpop.xlane.xlu0 %1622  ;;  %v1651_v48 = vsel %vm1617_vm6, %v4767_v47, 0.0 }
 0x3ec   : > { %v1631_v44 = vsub.f32 %v1614_v28, %v1623_v20 }
 0x3ee   : > { %v1636_v45 = vmul.f32 1.442695, %v1631_v44 }
 0x3f0   : > { %3622 = vpow2.f32 %v1636_v45 }
 0x3f3   : > { %1652 = vadd.xlane.f32.xlu2 %v1651_v48 }
 0x3f6   : > { %v4771_v49 = vpop.eup %3622 }
 0x3f7   : > { %v1645_v50 = vsel %vm1617_vm6, %v4771_v49, 0.0 }
 0x3f8   : > { %1646 = vadd.xlane.f32.xlu0 %v1645_v50 }
 0x3fb   : > { %v1626_v51 = vpop.xlane.xlu1 %1625 }
 0x3fc   : > { %v1632_v52 = vsub.f32 %v1615_v34, %v1626_v51 }
 0x3fe   : > { %v1638_v53 = vmul.f32 1.442695, %v1632_v52  ;;  %v1412_v58 = vpop.permute.xlu0 %1411 }
 0x3ff   : > { %v1426_v60 = vrot.slane %v1412_v58, 4  ;;  %v1429_v61 = vsel %vm1174_vm4, %v1412_v58, %v1428_v59 }
 0x400   : > { %3624 = vpow2.f32 %v1638_v53  ;;  %v1437_v63 = vperm.slane %v1429_v61, %v4661_v57 }
 0x401   : > { %v1427_v62 = vsel %vm1174_vm4, %v1426_v60, %v1406_v56 }
 0x402   : > { %v1433_v1 = vperm.slane %v1427_v62, %v4661_v57  ;;  %v1450_v6 = vrot.slane %v1437_v63, 4 }
 0x404   : > { %v1438_v9 = vrot.slane %v1433_v1, 4 }
 0x406   : > { %v4775_v54 = vpop.eup %3624 }
 0x407   : > { %v1648_v55 = vsel %vm1617_vm6, %v4775_v54, 0.0 }
 0x408   : > { %1649 = vadd.xlane.f32.xlu1 %v1648_v55 }
 0x413   : > { %v1409_v2 = vpop.permute.xlu1 %1408 }
 0x414   : > { %v1414_v3 = vrot.slane %v1409_v2, 4  ;;  %v1417_v5 = vsel %vm1174_vm4, %v1409_v2, %v1416_v0 }
 0x415   : > { %v1425_v7 = vperm.slane %v1417_v5, %v4661_v57 }
 0x416   : > { %v1415_v8 = vsel %vm1174_vm4, %v1414_v3, %v1159_v32 }
 0x417   : > { %v1421_v10 = vperm.slane %v1415_v8, %v4661_v57  ;;  %v1451_v11 = vsel %vm1174_vm4, %v1450_v6, %v1425_v7  ;;  %v1452_v12 = vrot.slane %v1425_v7, 4 }
 0x418   : > { %v1457_v13 = vperm.slane %v1451_v11, %v4666_v4 }
 0x419   : > { %v1439_v14 = vsel %vm1174_vm4, %v1438_v9, %v1421_v10  ;;  %v1440_v15 = vrot.slane %v1421_v10, 4  ;;  %v1453_v16 = vsel %vm1174_vm4, %v1437_v63, %v1452_v12 }
 0x41a   : > { %v1445_v18 = vperm.slane %v1439_v14, %v4666_v4  ;;  %v1461_v19 = vperm.slane %v1453_v16, %v4666_v4  ;;  %v1466_v23 = vrot.slane %v1457_v13, 4 }
 0x41b   : > { %v1441_v21 = vsel %vm1174_vm4, %v1433_v1, %v1440_v15 }
 0x41c   : > { %v1449_v22 = vperm.slane %v1441_v21, %v4666_v4  ;;  %v1468_v24 = vrot.slane %v1461_v19, 4  ;;  %v1462_v25 = vrot.slane %v1445_v18, 4  ;;  %v1467_v32 = vsel %vm1174_vm4, 0.0, %v1466_v23 }
 0x41e   : > { %v1464_v26 = vrot.slane %v1449_v22, 4  ;;  %v1469_v27 = vsel %vm1174_vm4, 0.0, %v1468_v24  ;;  %v1481_v28 = vsel %vm1174_vm4, %v1468_v24, %v1457_v13  ;;  %v1463_v38 = vsel %vm1174_vm4, 0.0, %v1462_v25 }
 0x41f   : > { %v1485_v29 = vperm.slane %v1481_v28, %v4661_v57  ;;  %v1486_v30 = vrot.slane %v1469_v27, 4 }
 0x420   : > { %v1465_v31 = vsel %vm1174_vm4, 0.0, %v1464_v26  ;;  %v1470_v33 = vsel %vm1174_vm4, %v1464_v26, %v1445_v18 }
 0x421   : > { %v1475_v34 = vrot.slane %v1465_v31, 4  ;;  %v1487_v35 = vsel %vm1174_vm4, %v1486_v30, %v1467_v32  ;;  %v1506_v36 = vrot.slane %v1485_v29, 4  ;;  %v1474_v37 = vperm.slane %v1470_v33, %v4661_v57 }
 0x422   : > { %v1491_v40 = vperm.slane %v1487_v35, %v4661_v57 }
 0x423   : > { %v1476_v41 = vsel %vm1174_vm4, %v1475_v34, %v1463_v38  ;;  %v1494_v42 = vrot.slane %v1474_v37, 4 }
 0x424   : > { %v1480_v39 = vperm.slane %v1476_v41, %v4661_v57  ;;  %v1507_v43 = vsel %vm1174_vm4, %v1491_v40, %v1506_v36  ;;  %v1504_v20 = vrot.slane %v1491_v40, 4 }
 0x425   : > { %v1515_v44 = vperm.slane %v1507_v43, %v4666_v4 }
 0x426   : > { %v1495_v45 = vsel %vm1174_vm4, %v1480_v39, %v1494_v42  ;;  %v1492_v48 = vrot.slane %v1480_v39, 4  ;;  %v1505_v50 = vsel %vm1174_vm4, %v1504_v20, %v1485_v29 }
 0x427   : > { %v1503_v51 = vperm.slane %v1495_v45, %v4666_v4  ;;  %v1520_v52 = vrot.slane %v1515_v44, 4  ;;  %v1511_v53 = vperm.slane %v1505_v50, %v4666_v4 }
 0x428   : > { %v1493_v55 = vsel %vm1174_vm4, %v1492_v48, %v1474_v37 }
 0x429   : > { %v1521_v56 = vsel %vm1174_vm4, %v1520_v52, %v1503_v51  ;;  %v1499_v58 = vperm.slane %v1493_v55, %v4666_v4  ;;  %v1516_v59 = vrot.slane %v1511_v53, 4  ;;  %v1522_v60 = vrot.slane %v1503_v51, 4 }
 0x42a   : > { %v1668_v61 = vpack.c.bf16 %v1521_v56, %v1521_v56 }
 0x42b   : > { %v1517_v62 = vsel %vm1174_vm4, %v1516_v59, %v1499_v58  ;;  %v1518_v63 = vrot.slane %v1499_v58, 4  ;;  %v1523_v0 = vsel %vm1174_vm4, %v1515_v44, %v1522_v60 }
 0x42c   : > { %v1713_v1 = vsel %vm1673_vm7, %v1668_v61, 0  ;;  %v1666_v2 = vpack.c.bf16 %v1517_v62, %v1517_v62  ;;  %v1669_v3 = vpack.c.bf16 %v1523_v0, %v1523_v0 }
 0x42d   : > { %1722 = vmatpush.bf16.msrb.mxu3 %v1713_v1  ;;  %v1519_v5 = vsel %vm1174_vm4, %v1511_v53, %v1518_v63 }
 0x42e   : > { %v1675_v6 = vsel %vm1673_vm7, %v1666_v2, 0  ;;  %v1732_v7 = vsel %vm1673_vm7, %v1669_v3, 0  ;;  %v1667_v8 = vpack.c.bf16 %v1519_v5, %v1519_v5 }
 0x42f   : > { %1684 = vmatpush.bf16.msrb.mxu2 %v1675_v6  ;;  %1741 = vmatpush.bf16.msra.mxu0 %v1732_v7 }
 0x430   : > { %v1694_v9 = vsel %vm1673_vm7, %v1667_v8, 0 }
 0x433   : > { %1703 = vmatpush.bf16.msra.mxu2 %v1694_v9 }
 0x45e   : > { %v1644_v10 = vpop.xlane.xlu2 %1643 }
 0x45f   : > { %3626 = vrcp.f32 %v1644_v10 }
 0x465   : > { %v3627_v11 = vpop.eup %3626 }
 0x466   : > { %v1658_v12 = vmul.f32 %v3627_v11, %v4763_v46  ;;  %v1653_v13 = vpop.xlane.xlu2 %1652 }
 0x467   : > { %3628 = vrcp.f32 %v1653_v13 }
 0x468   : > { %v1662_v14 = vpack.c.bf16 %v1658_v12, %v1658_v12 }
 0x46a   : > { %3042 = vmatmul.msk.bf16.vlgmr.msrb.gmra.mxu2 %vm1617_vm6, %v1662_v14 }
 0x46b   : > { %v1647_v15 = vpop.xlane.xlu0 %1646 }
 0x46c   : > { %3630 = vrcp.f32 %v1647_v15 }
 0x46d   : > { %v3629_v16 = vpop.eup %3628 }
 0x46e   : > { %v1661_v18 = vmul.f32 %v3629_v16, %v4767_v47 }
 0x470   : > { %v1665_v19 = vpack.c.bf16 %v1661_v18, %v1661_v18 }
 0x472   : > { %v3631_v21 = vpop.eup %3630  ;;  %3045 = vmatmul.msk.bf16.vlgmr.msra.gmra.mxu0 %vm1617_vm6, %v1665_v19 }
 0x473   : > { %v1659_v22 = vmul.f32 %v3631_v21, %v4771_v49 }
 0x475   : > { %v1663_v23 = vpack.c.bf16 %v1659_v22, %v1659_v22 }
 0x47a   : > { %3043 = vmatmul.msk.bf16.vlgmr.msra.gmra.mxu2 %vm1617_vm6, %v1663_v23 }
 0x47b   : > { %v1650_v46 = vpop.xlane.xlu1 %1649 }
 0x47c   : > { %3632 = vrcp.f32 %v1650_v46 }
 0x482   : > { %v3633_v24 = vpop.eup %3632 }
 0x483   : > { %v1660_v25 = vmul.f32 %v3633_v24, %v4775_v54 }
 0x485   : > { %v1664_v26 = vpack.c.bf16 %v1660_v25, %v1660_v25 }
 0x487   : > { %3044 = vmatmul.msk.bf16.vlgmr.msrb.gmra.mxu3 %vm1617_vm6, %v1664_v26 }
 0x4ed   : > { %v1686_v27 = vpop.f32.mrf.mxu2 }
 0x4ee   : > { %v1749_v36 = vrot.slane %v1686_v27, 4 }
 0x4ef   : > { %v1743_v28 = vpop.f32.mrf.mxu0 }
 0x4f0   : > { %v1759_v32 = vrot.slane %v1743_v28, 4 }
 0x4f5   : > { %v1688_v47 = vpop.f32.mrf.mxu2 }
 0x4f7   : > { %v1745_v29 = vpop.f32.mrf.mxu0 }
 0x4fd   : > { %v1705_v30 = vpop.f32.mrf.mxu2 }
 0x4fe   : > { %v1761_v31 = vrot.slane %v1705_v30, 4  ;;  %v1760_v34 = vsel %vm1174_vm4, %v1759_v32, %v1705_v30 }
 0x4ff   : > { %v1766_v54 = vperm.slane %v1760_v34, %v4661_v57  ;;  %v3370_v34 = vld [vmem:[%s4533_s9 + $0x28] sm:$0xff] }
 0x500   : > { %v1762_v49 = vsel %vm1174_vm4, %v1743_v28, %v1761_v31 }
 0x501   : > { %v1770_v35 = vperm.slane %v1762_v49, %v4661_v57  ;;  %v1771_v43 = vrot.slane %v1766_v54, 4 }
 0x503   : > { %v1783_v41 = vrot.slane %v1770_v35, 4 }
 0x505   : > { %v1707_v33 = vpop.f32.mrf.mxu2 }
 0x506   : > { %v3372_v33 = vld [vmem:[%s4533_s9 + $0x38] sm:$0xff] }
 0x507   : > { %1943 = vmatpush.bf16.msrb.mxu1 %v3372_v33  ;;  %v3389_v33 = vld [vmem:[%s4549_s15 + $0x84] sm:$0xf] }
 0x50a   : > { %v1724_v37 = vpop.f32.mrf.mxu3 }
 0x50b   : > { %v1747_v38 = vrot.slane %v1724_v37, 4  ;;  %v1750_v40 = vsel %vm1174_vm4, %v1724_v37, %v1749_v36  ;;  %v3368_v36 = vld [vmem:[%s4533_s9 + $0x18] sm:$0xff]  ;;  %v3366_v37 = vld [vmem:[%s4533_s9 + $0x8] sm:$0xff] }
 0x50c   : > { %v1758_v42 = vperm.slane %v1750_v40, %v4661_v57 }
 0x50d   : > { %v1748_v39 = vsel %vm1174_vm4, %v1747_v38, %v1686_v27  ;;  %v3365_v38 = vld [vmem:[%s4533_s9] sm:$0xff] }
 0x50e   : > { %v1754_v20 = vperm.slane %v1748_v39, %v4661_v57  ;;  %v1784_v44 = vsel %vm1174_vm4, %v1783_v41, %v1758_v42  ;;  %v1785_v45 = vrot.slane %v1758_v42, 4 }
 0x50f   : > { %v1790_v48 = vperm.slane %v1784_v44, %v4666_v4 }
 0x510   : > { %v1772_v50 = vsel %vm1174_vm4, %v1771_v43, %v1754_v20  ;;  %v1773_v51 = vrot.slane %v1754_v20, 4  ;;  %v1786_v52 = vsel %vm1174_vm4, %v1770_v35, %v1785_v45  ;;  %v3369_v35 = vld [vmem:[%s4533_s9 + $0x20] sm:$0xff] }
 0x511   : > { %v1778_v53 = vperm.slane %v1772_v50, %v4666_v4  ;;  %v1794_v55 = vperm.slane %v1786_v52, %v4666_v4  ;;  %v1799_v60 = vrot.slane %v1790_v48, 4  ;;  %v3610_v45 = vld [vmem:[%s5171_s26] ss:$0 sm:$0xff] }
 0x512   : > { %v1774_v56 = vsel %vm1174_vm4, %v1766_v54, %v1773_v51  ;;  %v1726_v58 = vpop.f32.mrf.mxu3  ;;  %v3367_v54 = vld [vmem:[%s4533_s9 + $0x10] sm:$0xff] }
 0x513   : > { %v1782_v59 = vperm.slane %v1774_v56, %v4666_v4  ;;  %v1801_v61 = vrot.slane %v1794_v55, 4  ;;  %v1795_v62 = vrot.slane %v1778_v53, 4  ;;  %v1800_v6 = vsel %vm1174_vm4, 0.0, %v1799_v60  ;;  %v3644_v51 = vld [vmem:[%s4577_s7] sm:$0xff]  ;;  %v3403_v56 = vld [vmem:[%s4549_s15 + $0xec] sm:$0xf0] }
 0x514   : > { %v3192_v55 = vld [vmem:[%s4549_s15 + $0xe0] sm:$0xf]  ;;  %v3401_v58 = vld [vmem:[%s4549_s15 + $0xe4] sm:$0xf]  ;;  %v3194_v60 = vld [vmem:[%s4549_s15 + $0xf0] sm:$0xf0] }
 0x515   : > { %v1797_v63 = vrot.slane %v1782_v59, 4  ;;  %v1802_v0 = vsel %vm1174_vm4, 0.0, %v1801_v61  ;;  %v1814_v1 = vsel %vm1174_vm4, %v1801_v61, %v1790_v48  ;;  %v1796_v12 = vsel %vm1174_vm4, 0.0, %v1795_v62  ;;  %v3200_v61 = vld [vmem:[%s4549_s15 + $0xe8] sm:$0xf] }
 0x516   : > { %v1818_v2 = vperm.slane %v1814_v1, %v4661_v57  ;;  %v1819_v3 = vrot.slane %v1802_v0, 4  ;;  %v3193_v59 = vor.u32 %v3403_v56, %v3192_v55  ;;  %v3404_v62 = vld [vmem:[%s4549_s15 + $0xf4] sm:$0xf0]  ;;  %v3402_v1 = vld [vmem:[%s4549_s15 + $0xec] sm:$0xf] }
 0x517   : > { %v1798_v5 = vsel %vm1174_vm4, 0.0, %v1797_v63  ;;  %v1803_v7 = vsel %vm1174_vm4, %v1797_v63, %v1778_v53  ;;  %v3197_v63 = vor.u32 %v3401_v58, %v3194_v60  ;;  %v3201_v0 = vor.u32 %v3404_v62, %v3200_v61  ;;  %v3138_v55 = vld [vmem:[%s4549_s15 + $0x78] sm:$0xf0]  ;;  %v3112_v58 = vld [vmem:[%s4549_s15 + $0x40] sm:$0xf] }
 0x518   : > { %v1820_v8 = vsel %vm1174_vm4, %v1819_v3, %v1800_v6  ;;  %v1807_v9 = vperm.slane %v1803_v7, %v4661_v57  ;;  %v1808_v10 = vrot.slane %v1798_v5, 4  ;;  %v1839_v11 = vrot.slane %v1818_v2, 4  ;;  %2190 = vmatpush.bf16.msrb.mxu2 %v3193_v59  ;;  %v3383_v59 = vld [vmem:[%s4549_s15 + $0x4c] sm:$0xf0]  ;;  %v3381_v60 = vld [vmem:[%s4549_s15 + $0x44] sm:$0xf] }
 0x519   : > { %v1824_v13 = vperm.slane %v1820_v8, %v4661_v57  ;;  %2203 = vmatpush.bf16.msra.mxu3 %v3197_v63  ;;  %2216 = vmatpush.bf16.msrb.mxu0 %v3201_v0  ;;  %v3113_v61 = vor.u32 %v3383_v59, %v3112_v58  ;;  %v3114_v62 = vld [vmem:[%s4549_s15 + $0x50] sm:$0xf0]  ;;  %v3120_v63 = vld [vmem:[%s4549_s15 + $0x48] sm:$0xf]  ;;  %v3384_v0 = vld [vmem:[%s4549_s15 + $0x54] sm:$0xf0] }
 0x51a   : > { %v1809_v14 = vsel %vm1174_vm4, %v1808_v10, %v1796_v12  ;;  %v1827_v15 = vrot.slane %v1807_v9, 4  ;;  %v3399_v10 = vld [vmem:[%s4549_s15 + $0xcc] sm:$0xf0]  ;;  %v3433_v58 = vld [vmem:[%s4573_s5 + $0xe0] sm:$0xff]  ;;  %v3410_v59 = vld [vmem:[%s4573_s5 + $0x28] sm:$0xff] }
 0x51b   : > { %v1813_v16 = vperm.slane %v1809_v14, %v4661_v57  ;;  %v1840_v18 = vsel %vm1174_vm4, %v1824_v13, %v1839_v11  ;;  %v1837_v19 = vrot.slane %v1824_v13, 4  ;;  %v3397_v11 = vld [vmem:[%s4549_s15 + $0xc4] sm:$0xf]  ;;  %v3178_v13 = vld [vmem:[%s4549_s15 + $0xd0] sm:$0xf0] }
 0x51c   : > { %v1848_v21 = vperm.slane %v1840_v18, %v4666_v4  ;;  %v3184_v14 = vld [vmem:[%s4549_s15 + $0xc8] sm:$0xf] }
 0x51d   : > { %v1828_v22 = vsel %vm1174_vm4, %v1813_v16, %v1827_v15  ;;  %v1825_v23 = vrot.slane %v1813_v16, 4  ;;  %v1838_v46 = vsel %vm1174_vm4, %v1837_v19, %v1818_v2  ;;  %v3202_v2 = vld [vmem:[%s4549_s15 + $0xf8] sm:$0xf0]  ;;  %v3400_v15 = vld [vmem:[%s4549_s15 + $0xd4] sm:$0xf0]  ;;  %v3181_v16 = vor.u32 %v3397_v11, %v3178_v13 }
 0x51e   : > { %v1836_v24 = vperm.slane %v1828_v22, %v4666_v4  ;;  %v1853_v25 = vrot.slane %v1848_v21, 4  ;;  %v1844_v26 = vperm.slane %v1838_v46, %v4666_v4  ;;  %v3205_v3 = vor.u32 %v3402_v1, %v3202_v2  ;;  %v3398_v19 = vld [vmem:[%s4549_s15 + $0xcc] sm:$0xf]  ;;  %v3395_v46 = vld [vmem:[%s4549_s15 + $0xac] sm:$0xf0] }
 0x51f   : > { %v1826_v27 = vsel %vm1174_vm4, %v1825_v23, %v1807_v9  ;;  %v3176_v9 = vld [vmem:[%s4549_s15 + $0xc0] sm:$0xf]  ;;  %v3185_v18 = vor.u32 %v3400_v15, %v3184_v14  ;;  %2204 = vmatpush.bf16.msra.mxu3 %v3181_v16  ;;  %v3117_v1 = vor.u32 %v3381_v60, %v3114_v62  ;;  %v3121_v2 = vor.u32 %v3384_v0, %v3120_v63  ;;  %v3098_v11 = vld [vmem:[%s4549_s15 + $0x30] sm:$0xf0]  ;;  %v3104_v13 = vld [vmem:[%s4549_s15 + $0x28] sm:$0xf] }
 0x520   : > { %v1854_v57 = vsel %vm1174_vm4, %v1853_v25, %v1836_v24  ;;  %v1855_v28 = vrot.slane %v1836_v24, 4  ;;  %v1832_v47 = vperm.slane %v1826_v27, %v4666_v4  ;;  %v1849_v29 = vrot.slane %v1844_v26, 4  ;;  %v3371_v4 = vld [vmem:[%s4533_s9 + $0x30] sm:$0xff]  ;;  %v3160_v23 = vld [vmem:[%s4549_s15 + $0xa0] sm:$0xf]  ;;  %s5172_s9 = scalar_lea.vmem [#allocation14], %s4513_s17 }
 0x521   : > { %1862 = vrot.lane.b32.xlu2 %v1854_v57, %s4132_s4  ;;  %1944 = vmatpush.bf16.msrb.mxu1 %v3371_v4  ;;  %v3177_v12 = vor.u32 %v3399_v10, %v3176_v9  ;;  %v3393_v24 = vld [vmem:[%s4549_s15 + $0xa4] sm:$0xf]  ;;  %v3161_v25 = vor.u32 %v3395_v46, %v3160_v23  ;;  %v3168_v27 = vld [vmem:[%s4549_s15 + $0xa8] sm:$0xf]  ;;  %v3396_v57 = vld [vmem:[%s4549_s15 + $0xb4] sm:$0xf0] }
 0x522   : > { %v1856_v30 = vsel %vm1174_vm4, %v1848_v21, %v1855_v28  ;;  %v1851_v31 = vrot.slane %v1832_v47, 4  ;;  %v1850_v32 = vsel %vm1174_vm4, %v1849_v29, %v1832_v47  ;;  %v3186_v21 = vld [vmem:[%s4549_s15 + $0xd8] sm:$0xf0]  ;;  %2217 = vmatpush.bf16.msrb.mxu0 %v3185_v18  ;;  %v3169_v47 = vor.u32 %v3396_v57, %v3168_v27  ;;  %v3394_v29 = vld [vmem:[%s4549_s15 + $0xac] sm:$0xf]  ;;  %v3409_v63 = vld [vmem:[%s4573_s5 + $0x20] sm:$0xff] }
 0x523   : > { %1866 = vrot.lane.b32.xlu0 %v1856_v30, %s4131_s23  ;;  %2191 = vmatpush.bf16.msrb.mxu2 %v3177_v12  ;;  %v3189_v22 = vor.u32 %v3398_v19, %v3186_v21  ;;  %v3170_v30 = vld [vmem:[%s4549_s15 + $0xb8] sm:$0xf0]  ;;  %v3379_v9 = vld [vmem:[%s4549_s15 + $0x2c] sm:$0xf0]  ;;  %v3377_v10 = vld [vmem:[%s4549_s15 + $0x24] sm:$0xf] }
 0x524   : > { %v1852_v49 = vsel %vm1174_vm4, %v1844_v26, %v1851_v31  ;;  %v3162_v26 = vld [vmem:[%s4549_s15 + $0xb0] sm:$0xf0]  ;;  %v3173_v31 = vor.u32 %v3394_v29, %v3170_v30  ;;  %v3380_v14 = vld [vmem:[%s4549_s15 + $0x34] sm:$0xf0]  ;;  %v3378_v15 = vld [vmem:[%s4549_s15 + $0x2c] sm:$0xf]  ;;  %v3101_v16 = vor.u32 %v3377_v10, %v3098_v11 }
 0x525   : > { %1858 = vrot.lane.b32.xlu1 %v1852_v49, %s4130_s19  ;;  %1945 = vmatpush.bf16.msrb.mxu1 %v3370_v34  ;;  %v3165_v28 = vor.u32 %v3393_v24, %v3162_v26  ;;  %v3391_v49 = vld [vmem:[%s4549_s15 + $0x8c] sm:$0xf0]  ;;  %v3146_v34 = vld [vmem:[%s4549_s15 + $0x90] sm:$0xf0]  ;;  %v3105_v18 = vor.u32 %v3380_v14, %v3104_v13  ;;  %v3106_v19 = vld [vmem:[%s4549_s15 + $0x38] sm:$0xf0] }
 0x526   : > { %2218 = vmatpush.bf16.msrb.mxu0 %v3169_v47  ;;  %v3080_v21 = vld [vmem:[%s4549_s15] sm:$0xf]  ;;  %v3109_v23 = vor.u32 %v3378_v15, %v3106_v19  ;;  %v3373_v46 = vld [vmem:[%s4549_s15 + $0x4] sm:$0xf]  ;;  %v3082_v24 = vld [vmem:[%s4549_s15 + $0x10] sm:$0xf0] }
 0x527   : > { %2192 = vmatpush.bf16.msrb.mxu2 %v3161_v25  ;;  %2205 = vmatpush.bf16.msra.mxu3 %v3165_v28  ;;  %v3088_v25 = vld [vmem:[%s4549_s15 + $0x8] sm:$0xf]  ;;  %v3376_v26 = vld [vmem:[%s4549_s15 + $0x14] sm:$0xf0]  ;;  %v3374_v27 = vld [vmem:[%s4549_s15 + $0xc] sm:$0xf]  ;;  %v3085_v29 = vor.u32 %v3373_v46, %v3082_v24 }
 0x528   : > { %v3090_v57 = vld [vmem:[%s4549_s15 + $0x18] sm:$0xf0]  ;;  %v3089_v30 = vor.u32 %v3376_v26, %v3088_v25  ;;  %v3418_v60 = vld [vmem:[%s4573_s5 + $0x68] sm:$0xff]  ;;  %v3417_v0 = vld [vmem:[%s4573_s5 + $0x60] sm:$0xff]  ;;  %s3995_s19 = scalar_lea.hbm %s5176_s13, 16 }
 0x529   : > { %1946 = vmatpush.bf16.msrb.mxu1 %v3369_v35  ;;  %v3152_v35 = vld [vmem:[%s4549_s15 + $0x88] sm:$0xf]  ;;  %v3432_v62 = vld [vmem:[%s4573_s5 + $0xd8] sm:$0xff]  ;;  %v3415_v10 = vld [vmem:[%s4573_s5 + $0x50] sm:$0xff] }
 0x52a   : > { %v2020_v11 = vld [vmem:[%s4567_s14] sm:$0xf] }
 0x52b   : > { %v3429_v13 = vld [vmem:[%s4573_s5 + $0xc0] sm:$0xff]  ;;  %v2024_v14 = vperm.slane %v2020_v11, 2  ;;  %v2025_v15 = vperm.slane %v2020_v11, 3  ;;  %v2022_v25 = vperm.slane %v2020_v11, 0  ;;  %v2023_v26 = vperm.slane %v2020_v11, 1 }
 0x52c   : > { %v3405_v46 = vld [vmem:[%s4573_s5] sm:$0xff] }
 0x52d   : > { %1947 = vmatpush.bf16.msrb.mxu1 %v3368_v36  ;;  %v3392_v36 = vld [vmem:[%s4549_s15 + $0x94] sm:$0xf0]  ;;  %v3413_v24 = vld [vmem:[%s4573_s5 + $0x40] sm:$0xff] }
 0x531   : > { %1948 = vmatpush.bf16.msrb.mxu1 %v3367_v54  ;;  %v3149_v54 = vor.u32 %v3389_v33, %v3146_v34  ;;  %v3436_v33 = vld [vmem:[%s4573_s5 + $0xf8] sm:$0xff] }
 0x533   : > { %2206 = vmatpush.bf16.msra.mxu3 %v3149_v54 }
 0x535   : > { %1949 = vmatpush.bf16.msrb.mxu1 %v3366_v37  ;;  %v3153_v37 = vor.u32 %v3392_v36, %v3152_v35 }
 0x537   : > { %2219 = vmatpush.bf16.msrb.mxu0 %v3153_v37 }
 0x539   : > { %1950 = vmatpush.bf16.msrb.mxu1 %v3365_v38  ;;  %v3390_v38 = vld [vmem:[%s4549_s15 + $0x8c] sm:$0xf] }
 0x53d   : > { %2229 = vmatpush.bf16.msra.mxu1 %v3205_v3  ;;  %v3382_v3 = vld [vmem:[%s4549_s15 + $0x4c] sm:$0xf] }
 0x541   : > { %2230 = vmatpush.bf16.msra.mxu1 %v3189_v22  ;;  %v3375_v22 = vld [vmem:[%s4549_s15 + $0xc] sm:$0xf0] }
 0x542   : > { %v3081_v28 = vor.u32 %v3375_v22, %v3080_v21 }
 0x545   : > { %2231 = vmatpush.bf16.msra.mxu1 %v3173_v31 }
 0x57b   : > { %v1863_v41 = vpop.permute.xlu2 %1862 }
 0x595   : > { %v1867_v39 = vpop.permute.xlu0 %1866 }
 0x597   : > { %v1859_v40 = vpop.permute.xlu1 %1858 }
 0x598   : > { %v1869_v42 = vsel %vm1532_vm5, %v1850_v32, %v1859_v40  ;;  %v3144_v32 = vld [vmem:[%s4549_s15 + $0x80] sm:$0xf]  ;;  %v3154_v40 = vld [vmem:[%s4549_s15 + $0x98] sm:$0xf0] }
 0x599   : > { %v1871_v43 = vsel %vm1870_vm8, %v1869_v42, %v1863_v41  ;;  %v3145_v4 = vor.u32 %v3391_v49, %v3144_v32  ;;  %v3157_v41 = vor.u32 %v3390_v38, %v3154_v40  ;;  %v3128_v42 = vld [vmem:[%s4549_s15 + $0x60] sm:$0xf]  ;;  %v3093_v32 = vor.u32 %v3374_v27, %v3090_v57  ;;  %v3428_v49 = vld [vmem:[%s4573_s5 + $0xb8] sm:$0xff] }
 0x59a   : > { %v1873_v20 = vsel %vm1872_vm9, %v1871_v43, %v1867_v39  ;;  %v3387_v39 = vld [vmem:[%s4549_s15 + $0x6c] sm:$0xf0]  ;;  %v3385_v43 = vld [vmem:[%s4549_s15 + $0x64] sm:$0xf]  ;;  %v3611_v38 = vld [vmem:[%s5172_s9] ss:$0 sm:$0xff] }
 0x59b   : > { %v1874_v44 = vpack.c.bf16 %v1873_v20, %v1873_v20  ;;  %2193 = vmatpush.bf16.msrb.mxu2 %v3145_v4  ;;  %2232 = vmatpush.bf16.msra.mxu1 %v3157_v41  ;;  %v3129_v20 = vor.u32 %v3387_v39, %v3128_v42  ;;  %v3612_v42 = vld [vmem:[%s5173_s1] ss:$0 sm:$0xff] }
 0x59d   : > { %1951 = vmatmul.bf16.vlgmr.msrb.gmra.mxu1 %v1874_v44  ;;  %v3130_v44 = vld [vmem:[%s4549_s15 + $0x70] sm:$0xf0] }
 0x59f   : > { %2194 = vmatpush.bf16.msrb.mxu2 %v3129_v20 }
 0x5a3   : > { %2195 = vmatpush.bf16.msrb.mxu2 %v3113_v61  ;;  %v3424_v61 = vld [vmem:[%s4573_s5 + $0x98] sm:$0xff] }
 0x61a   : > { %v1952_v48 = vpop.f32.mrf.mxu1 }
 0x61b   : > { %v1953_v50 = vadd.f32 %v3610_v45, %v1952_v48  ;;  %v3136_v45 = vld [vmem:[%s4549_s15 + $0x68] sm:$0xf]  ;;  %v3388_v48 = vld [vmem:[%s4549_s15 + $0x74] sm:$0xf0] }
 0x61d   : > { %v4886_v52 = vadd.f32 %v3644_v51, %v1953_v50  ;;  %v3133_v50 = vor.u32 %v3385_v43, %v3130_v44  ;;  %v3137_v51 = vor.u32 %v3388_v48, %v3136_v45  ;;  %v3427_v44 = vld [vmem:[%s4573_s5 + $0xb0] sm:$0xff]  ;;  %v3420_v48 = vld [vmem:[%s4573_s5 + $0x78] sm:$0xff] }
 0x61e   : > { %v3435_v45 = vld [vmem:[%s4573_s5 + $0xf0] sm:$0xff] }
 0x61f   : > { %1959 = vadd.xlane.f32.xlu1 %v4886_v52  ;;  %2207 = vmatpush.bf16.msra.mxu3 %v3133_v50  ;;  %v3426_v50 = vld [vmem:[%s4573_s5 + $0xa8] sm:$0xff] }
 0x620   : > { %2220 = vmatpush.bf16.msrb.mxu0 %v3137_v51  ;;  %v3434_v51 = vld [vmem:[%s4573_s5 + $0xe8] sm:$0xff] }
 0x622   : > { %v1954_v53 = vpop.f32.mrf.mxu1 }
 0x623   : > { %v3386_v53 = vld [vmem:[%s4549_s15 + $0x6c] sm:$0xf]  ;;  %2208 = vmatpush.bf16.msra.mxu3 %v3117_v1  ;;  %v3423_v1 = vld [vmem:[%s4573_s5 + $0x90] sm:$0xff] }
 0x624   : > { %v3141_v56 = vor.u32 %v3386_v53, %v3138_v55  ;;  %2221 = vmatpush.bf16.msrb.mxu0 %v3121_v2  ;;  %v3411_v53 = vld [vmem:[%s4573_s5 + $0x30] sm:$0xff] }
 0x625   : > { %v3419_v55 = vld [vmem:[%s4573_s5 + $0x70] sm:$0xff] }
 0x626   : > { %2233 = vmatpush.bf16.msra.mxu1 %v3141_v56  ;;  %v3425_v56 = vld [vmem:[%s4573_s5 + $0xa0] sm:$0xff]  ;;  %v3431_v2 = vld [vmem:[%s4573_s5 + $0xd0] sm:$0xff] }
 0x627   : > { %2209 = vmatpush.bf16.msra.mxu3 %v3101_v16  ;;  %v3406_v16 = vld [vmem:[%s4573_s5 + $0x8] sm:$0xff] }
 0x628   : > { %2222 = vmatpush.bf16.msrb.mxu0 %v3105_v18  ;;  %v3414_v18 = vld [vmem:[%s4573_s5 + $0x48] sm:$0xff] }
 0x62b   : > { %2210 = vmatpush.bf16.msra.mxu3 %v3085_v29 }
 0x62c   : > { %2223 = vmatpush.bf16.msrb.mxu0 %v3089_v30 }
 0x62f   : > { %2555 = vmatpush.bf16.msrb.mxu3 %v3420_v48 }
 0x630   : > { %2568 = vmatpush.bf16.msra.mxu0 %v3428_v49 }
 0x633   : > { %2556 = vmatpush.bf16.msrb.mxu3 %v3419_v55 }
 0x634   : > { %2569 = vmatpush.bf16.msra.mxu0 %v3427_v44 }
 0x637   : > { %2557 = vmatpush.bf16.msrb.mxu3 %v3418_v60 }
 0x638   : > { %2570 = vmatpush.bf16.msra.mxu0 %v3426_v50 }
 0x63b   : > { %2558 = vmatpush.bf16.msrb.mxu3 %v3417_v0 }
 0x63c   : > { %2571 = vmatpush.bf16.msra.mxu0 %v3425_v56 }
 0x640   : > { %2572 = vmatpush.bf16.msra.mxu0 %v3424_v61 }
 0x644   : > { %2573 = vmatpush.bf16.msra.mxu0 %v3423_v1 }
 0x692   : > { %v1960_v5 = vpop.xlane.xlu1 %1959 }
 0x693   : > { %v1961_v6 = vmul.f32 %v1960_v5, %v4589_v17  ;;  %v3122_v5 = vld [vmem:[%s4549_s15 + $0x58] sm:$0xf0] }
 0x695   : > { %v4899_v7 = vsub.f32 %v4886_v52, %v1961_v6  ;;  %v3096_v6 = vld [vmem:[%s4549_s15 + $0x20] sm:$0xf] }
 0x696   : > { %v3097_v12 = vor.u32 %v3379_v9, %v3096_v6  ;;  %v3422_v6 = vld [vmem:[%s4573_s5 + $0x88] sm:$0xff]  ;;  %v3407_v9 = vld [vmem:[%s4573_s5 + $0x10] sm:$0xff] }
 0x697   : > { %v1963_v8 = vmul.f32 %v4899_v7, %v4899_v7  ;;  %2574 = vmatpush.bf16.msra.mxu0 %v3422_v6 }
 0x698   : > { %2196 = vmatpush.bf16.msrb.mxu2 %v3097_v12  ;;  %v3421_v12 = vld [vmem:[%s4573_s5 + $0x80] sm:$0xff] }
 0x699   : > { %1964 = vadd.xlane.f32.xlu0 %v1963_v8  ;;  %v3125_v8 = vor.u32 %v3382_v3, %v3122_v5  ;;  %v3408_v3 = vld [vmem:[%s4573_s5 + $0x18] sm:$0xff] }
 0x69a   : > { %v3416_v5 = vld [vmem:[%s4573_s5 + $0x58] sm:$0xff] }
 0x69b   : > { %2234 = vmatpush.bf16.msra.mxu1 %v3125_v8  ;;  %v3430_v8 = vld [vmem:[%s4573_s5 + $0xc8] sm:$0xff]  ;;  %2559 = vmatpush.bf16.msrb.mxu3 %v3416_v5 }
 0x69c   : > { %2197 = vmatpush.bf16.msrb.mxu2 %v3081_v28  ;;  %2575 = vmatpush.bf16.msra.mxu0 %v3421_v12 }
 0x69f   : > { %2235 = vmatpush.bf16.msra.mxu1 %v3109_v23  ;;  %2560 = vmatpush.bf16.msrb.mxu3 %v3415_v10 }
 0x6a3   : > { %2236 = vmatpush.bf16.msra.mxu1 %v3093_v32  ;;  %2561 = vmatpush.bf16.msrb.mxu3 %v3414_v18 }
 0x6a7   : > { %2581 = vmatpush.bf16.msrb.mxu1 %v3436_v33  ;;  %2562 = vmatpush.bf16.msrb.mxu3 %v3413_v24 }
 0x6ab   : > { %2582 = vmatpush.bf16.msrb.mxu1 %v3435_v45 }
 0x6af   : > { %2583 = vmatpush.bf16.msrb.mxu1 %v3434_v51 }
 0x6b3   : > { %2584 = vmatpush.bf16.msrb.mxu1 %v3433_v58 }
 0x6b7   : > { %2585 = vmatpush.bf16.msrb.mxu1 %v3432_v62 }
 0x6bb   : > { %2586 = vmatpush.bf16.msrb.mxu1 %v3431_v2 }
 0x6bf   : > { %2587 = vmatpush.bf16.msrb.mxu1 %v3430_v8 }
 0x6c3   : > { %2588 = vmatpush.bf16.msrb.mxu1 %v3429_v13 }
 0x70c   : > { %v1965_v47 = vpop.xlane.xlu0 %1964 }
 0x70d   : > { %v1966_v31 = vmul.f32 %v1965_v47, %v4589_v17 }
 0x70f   : > { %v1967_v4 = vadd.f32 1e-05, %v1966_v31 }
 0x711   : > { %3634 = vrsqrt.f32 %v1967_v4  ;;  %vm1974_vm11 = vweird.f32 %v1967_v4 }
 0x717   : > { %v3635_v34 = vpop.eup %3634 }
 0x718   : > { %v1969_v35 = vmul.f32 %v3635_v34, %v1967_v4  ;;  %vm1975_vm10 = vweird.f32 %v3635_v34 }
 0x719   : > { %vm1976_vm12 = vmor %vm1974_vm11, %vm1975_vm10 }
 0x71a   : > { %v1970_v36 = vmul.f32 %v3635_v34, %v1969_v35 }
 0x71c   : > { %v1971_v54 = vmul.f32 0.5, %v1970_v36 }
 0x71e   : > { %v1972_v37 = vsub.f32 1.5, %v1971_v54 }
 0x720   : > { %v1973_v17 = vmul.f32 %v3635_v34, %v1972_v37 }
 0x722   : > { %v1977_v40 = vsel %vm1976_vm12, %v3635_v34, %v1973_v17 }
 0x723   : > { %v1978_v41 = vmul.f32 %v1977_v40, %v4899_v7  ;;  %v3412_v7 = vld [vmem:[%s4573_s5 + $0x38] sm:$0xff]  ;;  %s5174_s5 = sld [smem:[#allocation35_spill]] }
 0x724   : > { %2542 = vmatpush.bf16.msra.mxu2 %v3412_v7 }
 0x725   : > { %v1982_v39 = vmul.f32 %v3611_v38, %v1978_v41 }
 0x727   : > { %v1986_v43 = vadd.f32 %v3612_v42, %v1982_v39 }
 0x728   : > { %2543 = vmatpush.bf16.msra.mxu2 %v3411_v53 }
 0x729   : > { %v1987_v20 = vpack.c.bf16 %v1986_v43, %v1986_v43  ;;  %s3335_s15 = sshll.u32 %s5174_s5, 3 }
 0x72a   : > { %s2607_s27 = scalar_lea.hbm %s5176_s13, %s3335_s15 }
 0x72b   : > { %2198 = vmatmul.bf16.vlgmr.msrb.gmra.mxu2 %v1987_v20  ;;  %2211 = vmatmul.bf16.vlgmr.msra.gmra.mxu3 %v1987_v20  ;;  %s2611_s0 = sshll.u32 %s2607_s27, 4  ;;  %s2612_s0 = int_to_ptr.hbm [resolvable:$true] %s2611_s0 }
 0x72c   : > { %2224 = vmatmul.bf16.vlgmr.msrb.gmra.mxu0 %v1987_v20  ;;  %2237 = vmatmul.bf16.vlgmr.msra.gmra.mxu1 %v1987_v20  ;;  %s3989_s16 = sshra.s32 %s2612_s0, 4  ;;  %s3990_s16 = int_to_ptr.hbm [resolvable:$true] %s3989_s16 }
 0x72d   : > { %2544 = vmatpush.bf16.msra.mxu2 %v3410_v59  ;;  %s3991_s6 = scalar_lea.hbm %s3990_s16, 8  ;;  %p3996_p5 = scmp.lt.s32.totalorder %s3990_s16, %s5176_s13 }
 0x72e   : > { %p3992_p12 = scmp.ne.s32.totalorder %s3990_s16, %s3991_s6  ;;  %p3997_p2 = scmp.lt.s32.totalorder %s3995_s19, %s3991_s6 }
 0x730   : > { %p3993_p13 = pnand %p3992_p12, %p4333_p8  ;;  %p3998_p6 = por %p3997_p2, %p3996_p5 }
 0x731   : > { %2545 = vmatpush.bf16.msra.mxu2 %v3409_v63 }
 0x732   : > { %p3994_p0 = pneg %p3993_p13 }
 0x734   : > { %p3999_p1 = pnand %p3998_p6, %p3994_p0 }
 0x735   : > { %2546 = vmatpush.bf16.msra.mxu2 %v3408_v3 }
 0x739   : > { %2547 = vmatpush.bf16.msra.mxu2 %v3407_v9 }
 0x73d   : > { %2548 = vmatpush.bf16.msra.mxu2 %v3406_v16 }
 0x741   : > { %2549 = vmatpush.bf16.msra.mxu2 %v3405_v46 }
 0x7a9   : > { %v2225_v19 = vpop.f32.mrf.mxu0  ;;  %v2238_v21 = vpop.f32.mrf.mxu1 }
 0x7aa   : > { %v2226_v22 = vadd.f32 %v2225_v19, %v2024_v14  ;;  %v2239_v23 = vadd.f32 %v2238_v21, %v2025_v15  ;;  %v3613_v14 = vld [vmem:[%s908_s2] ss:$0 sm:$0xff]  ;;  %s2597_s2 = scalar_lea.sflag [#allocation4], %s4491_s3 }
 0x7ac   : > { %v2244_v27 = vmul.f32 %v2226_v22, %v2226_v22  ;;  %v2245_v57 = vmul.f32 %v2239_v23, %v2239_v23 }
 0x7ae   : > { %v2248_v28 = vmul.f32 %v2244_v27, %v2226_v22  ;;  %v2249_v47 = vmul.f32 %v2245_v57, %v2239_v23  ;;  %v2199_v29 = vpop.f32.mrf.mxu2  ;;  %v2212_v30 = vpop.f32.mrf.mxu3 }
 0x7af   : > { %v2200_v31 = vadd.f32 %v2199_v29, %v2022_v25  ;;  %v2213_v32 = vadd.f32 %v2212_v30, %v2023_v26 }
 0x7b0   : > { %v2252_v49 = vmul.f32 0.044715, %v2248_v28  ;;  %v2253_v33 = vmul.f32 0.044715, %v2249_v47 }
 0x7b1   : > { %v2242_v4 = vmul.f32 %v2200_v31, %v2200_v31  ;;  %v2243_v34 = vmul.f32 %v2213_v32, %v2213_v32  ;;  %v2227_v35 = vpop.f32.mrf.mxu0  ;;  %v2240_v36 = vpop.f32.mrf.mxu1 }
 0x7b2   : > { %v2256_v54 = vadd.f32 %v2252_v49, %v2226_v22  ;;  %v2257_v37 = vadd.f32 %v2253_v33, %v2239_v23 }
 0x7b3   : > { %v2246_v17 = vmul.f32 %v2242_v4, %v2200_v31  ;;  %v2247_v38 = vmul.f32 %v2243_v34, %v2213_v32 }
 0x7b4   : > { %v2260_v40 = vmul.f32 0.7978846, %v2256_v54  ;;  %v2261_v41 = vmul.f32 0.7978846, %v2257_v37 }
 0x7b5   : > { %v2250_v42 = vmul.f32 0.044715, %v2246_v17  ;;  %v2251_v39 = vmul.f32 0.044715, %v2247_v38 }
 0x7b6   : > { %3636 = vtanh.f32 %v2260_v40  ;;  %v2201_v43 = vpop.f32.mrf.mxu2  ;;  %v2214_v20 = vpop.f32.mrf.mxu3 }
 0x7b7   : > { %3638 = vtanh.f32 %v2261_v41  ;;  %v2254_v44 = vadd.f32 %v2250_v42, %v2200_v31  ;;  %v2255_v45 = vadd.f32 %v2251_v39, %v2213_v32 }
 0x7b9   : > { %v2258_v7 = vmul.f32 0.7978846, %v2254_v44  ;;  %v2259_v48 = vmul.f32 0.7978846, %v2255_v45 }
 0x7bb   : > { %3640 = vtanh.f32 %v2258_v7 }
 0x7bc   : > { %v3637_v50 = vpop.eup %3636  ;;  %3642 = vtanh.f32 %v2259_v48 }
 0x7bd   : > { %v3639_v51 = vpop.eup %3638  ;;  %v2268_v53 = vadd.f32 1.0, %v3637_v50 }
 0x7be   : > { %v2269_v55 = vadd.f32 1.0, %v3639_v51 }
 0x7bf   : > { %v2272_v56 = vmul.f32 0.5, %v2268_v53 }
 0x7c0   : > { %v2273_v58 = vmul.f32 0.5, %v2269_v55 }
 0x7c1   : > { %v3641_v59 = vpop.eup %3640  ;;  %v2276_v60 = vmul.f32 %v2272_v56, %v2226_v22 }
 0x7c2   : > { %v3643_v61 = vpop.eup %3642  ;;  %v2277_v62 = vmul.f32 %v2273_v58, %v2239_v23  ;;  %v2266_v63 = vadd.f32 1.0, %v3641_v59 }
 0x7c3   : > { %v2280_v0 = vpack.c.bf16 %v2276_v60, %v2276_v60  ;;  %v2267_v1 = vadd.f32 1.0, %v3643_v61 }
 0x7c4   : > { %v2281_v2 = vpack.c.bf16 %v2277_v62, %v2277_v62  ;;  %v2270_v3 = vmul.f32 0.5, %v2266_v63 }
 0x7c5   : > { %2576 = vmatmul.bf16.vlgmr.msra.gmra.mxu0 %v2280_v0  ;;  %v2271_v5 = vmul.f32 0.5, %v2267_v1 }
 0x7c6   : > { %2589 = vmatmul.bf16.vlgmr.msrb.gmra.mxu1 %v2281_v2  ;;  %v2274_v6 = vmul.f32 %v2270_v3, %v2200_v31 }
 0x7c7   : > { %v2275_v8 = vmul.f32 %v2271_v5, %v2213_v32 }
 0x7c8   : > { %v2278_v9 = vpack.c.bf16 %v2274_v6, %v2274_v6 }
 0x7c9   : > { %v2279_v10 = vpack.c.bf16 %v2275_v8, %v2275_v8 }
 0x7ca   : > { %2550 = vmatmul.bf16.vlgmr.msra.gmra.mxu2 %v2278_v9 }
 0x7cb   : > { %2563 = vmatmul.bf16.vlgmr.msrb.gmra.mxu3 %v2279_v10 }
 0x842   : > { %v2577_v11 = vpop.f32.mrf.mxu0 }
 0x843   : > { %v2590_v12 = vpop.f32.mrf.mxu1 }
 0x84a   : > { %v2579_v13 = vpop.f32.mrf.mxu0 }
 0x84b   : > { %v2592_v15 = vpop.f32.mrf.mxu1 }
 0x84d   : > { %v2551_v16 = vpop.f32.mrf.mxu2 }
 0x84e   : > { %v2552_v18 = vadd.f32 %v3613_v14, %v2551_v16  ;;  %v2564_v19 = vpop.f32.mrf.mxu3 }
 0x850   : > { %v2565_v21 = vadd.f32 %v2564_v19, %v2552_v18 }
 0x852   : > { %v2578_v22 = vadd.f32 %v2577_v11, %v2565_v21 }
 0x854   : > { %v2591_v23 = vadd.f32 %v2590_v12, %v2578_v22 }
 0x855   : > { %v2553_v46 = vpop.f32.mrf.mxu2 }
 0x856   : > { %v2566_v24 = vpop.f32.mrf.mxu3  ;;  %v2594_v25 = vadd.f32 %v2591_v23, %v4886_v52 }
 0x858   : > { %2595 = vst [vmem:[%s4577_s7] sm:$0xff] %v2594_v25 }
 0x859   : > { %4002 = shalt.err (!%p3999_p1)
}
 0x85a   : > { %3465 = dma.vmem_to_hbm [thread:$0]  (%p4333_p8), %s2610_s28, 128, %s2612_s0, %s2597_s2  }
 0x85b PF: > { %s5178_s7 = sld [smem:[#allocation36_spill]] }
 0x85c   : > { %s5179_s3 = sld [smem:[#allocation31_spill]] }
 0x861   : > { %p3506_p3 = scmp.ge.s32.totalorder %s5178_s7, 2 }
 0x862   : > { %s2623_s26 = sand.u32 1, %s5179_s3  }
 0x863   : > { %p3502_p10 = pnand %p3506_p3, %p4340_p9  ;;  %s2624_s9 = scalar_lea.sflag [#allocation4], %s2623_s26 }
 0x865   : > { %p3503_p11 = pneg %p3502_p10 }
 0x867   : > { %4076 = dma.done.wait (%p3503_p11), %s2624_s9, 128  }
 0x868   : > { %4078 = vsyncadd (%p3503_p11), %s2624_s9, 4294967168  ;;  %s45_s23 = sadd.s32 1, %s5178_s7   ;;  %s5181_s29 = sld [smem:[#allocation29_spill]] }
 0x869   : > { %p42_p4 = scmp.ge.s32.totalorder %s45_s23, 6   ;;  %s5182_s30 = sld [smem:[#allocation30_spill]] }
 0x86a   : > { %s5183_s15 = sld [smem:[#allocation41_spill]]  ;;  %s5189_s19 = smov %s4113_s21 }
 0x86b   : > { %s5184_s16 = sld [smem:[#allocation32_spill]]  ;;  %s5190_s20 = smov %s4117_s22 }
 0x86c   : > { %s5185_s17 = sld [smem:[#allocation33_spill]] }
 0x86d   : > { %s5186_s18 = sld [smem:[#allocation42_spill]] }
 0x86e   : > { %s5187_s1 = sld [smem:[#allocation38_spill]] }
 0x86f   : > { %s5188_s5 = sld [smem:[#allocation39_spill]] }
 0x871   :  { %44 = sbr.rel (!%p42_p4) target bundleno = 32 (0x20), region = 254 }
 0x874   : > { %s5191_s21 = smov %s5187_s1 }
 0x875   : > { %s5192_s22 = smov %s5188_s5 }
 0x876   :  { %2630 = vsyncpa [#allocation3], 1 }
 0x877   :  { %2632 = vsyncpa [#allocation3 + $0x1], 1 }
 0x878   :  { %2633 = vsyncpa [#allocation6], 1 }
 0x879   :  { %2635 = vsyncpa [#allocation6 + $0x1], 1 }
 0x87a   :  { %2636 = vsyncpa [#allocation9], 1 }
 0x87b   :  { %2638 = vsyncpa [#allocation9 + $0x1], 1 }
 0x87c   :  { %2639 = vsyncpa [#allocation12], 1 }
 0x87d   :  { %2641 = vsyncpa [#allocation12 + $0x1], 1 }
 0x87e   :  { %2642 = vsyncpa [#allocation15], 1 }
 0x87f   :  { %2644 = vsyncpa [#allocation15 + $0x1], 1 }
 0x880   :  { %2645 = vsyncpa [#allocation18], 1 }
 0x881   :  { %2647 = vsyncpa [#allocation18 + $0x1], 1 }
 0x882   :  { %2648 = vsyncpa [#allocation4], 1 }
 0x883   :  { %2650 = vsyncpa [#allocation4 + $0x1], 1 }

</bundles_post_ra>
